<compile_context>
chip_gen: v7x
topology: tpu7x:2x2x1
jax: 0.10.0
libtpu: 0.0.40
codegen_flags: <defaults>
</compile_context>

<pallas_src>
import jax
import jax.numpy as jnp
from jax.experimental import pallas as pl
from jax.experimental.pallas import tpu as pltpu


def _round_up(x, m):
    return (x + m - 1) // m * m


# ---------------------------------------------------------------------------
# Kernels
# ---------------------------------------------------------------------------

def _ffn_kernel_resident(x_ref, w1_ref, b1_ref, w2_ref, b2_ref, o_ref):
    """Weights resident in VMEM; single K step -> no accumulator round trip."""
    x = x_ref[...].astype(jnp.bfloat16)                       # cast in-kernel (VPU)
    h = jnp.dot(x, w1_ref[...], preferred_element_type=jnp.float32)
    h = jnp.maximum(h + b1_ref[...], 0.0)                     # bias + ReLU
    y = jnp.dot(h.astype(jnp.bfloat16), w2_ref[...],
                preferred_element_type=jnp.float32)
    o_ref[...] = (y + b2_ref[...]).astype(o_ref.dtype)
    # Dropout(p=0.0): identity -> nothing to do.


def _ffn_kernel_tiled(x_ref, w1_ref, b1_ref, w2_ref, b2_ref, o_ref, acc_ref):
    """Hidden dim tiled on grid axis j; f32 accumulator resident across j."""
    j = pl.program_id(1)

    @pl.when(j == 0)
    def _():
        acc_ref[...] = jnp.zeros_like(acc_ref)

    x = x_ref[...].astype(jnp.bfloat16)
    h = jnp.dot(x, w1_ref[...], preferred_element_type=jnp.float32)
    h = jnp.maximum(h + b1_ref[...], 0.0)
    acc_ref[...] += jnp.dot(h.astype(jnp.bfloat16), w2_ref[...],
                            preferred_element_type=jnp.float32)

    @pl.when(j == pl.num_programs(1) - 1)
    def _():
        o_ref[...] = (acc_ref[...] + b2_ref[...]).astype(o_ref.dtype)
    # Dropout(p=0.0): identity -> nothing to do.


# ---------------------------------------------------------------------------
# Tiling / budget helpers (all static Python ints)
# ---------------------------------------------------------------------------

def _vmem_budget_bytes():
    """Per-part VMEM budget with ~1/8 headroom for compiler-internal scratch."""
    try:
        cap = int(pltpu.get_tpu_info().vmem_capacity_bytes)
    except Exception:
        cap = 64 * 1024 * 1024            # conservative (v7x-sized) fallback
    return min(cap * 7 // 8, 128 * 1024 * 1024)


def _pick_row_tile(M, tm_max):
    """Sublane-aligned row tile; >=2 row tiles whenever M allows (v7x megacore)."""
    if M < 256:
        return min(_round_up(M, 8), 128)
    half = max(128, (M // 2) // 128 * 128)
    return max(128, min(tm_max, half))


def _pick_hidden_tile(H, cap):
    """Largest divisor of H that is a multiple of 128 and <= cap; else full H
    (full-extent block is the only other lane-legal choice)."""
    cap = min(cap, H)
    d = (cap // 128) * 128
    while d >= 128:
        if H % d == 0:
            return d
        d -= 128
    return H


def _est_vmem_resident(tm, C, H):
    bf16, f32 = 2, 4
    return (2 * tm * C * f32                    # x tile (f32 in, double buffered)
            + 2 * (C * H + H * C) * bf16        # W1/W2 (constant index map)
            + 2 * (H + C) * f32                 # biases
            + 2 * tm * C * f32                  # out tile
            + tm * H * f32)                     # f32 intermediate h


def _est_vmem_tiled(tm, th, C, H):
    bf16, f32 = 2, 4
    return (2 * tm * C * f32                    # x tile
            + 2 * (C * th + th * C) * bf16      # W1/W2 slabs
            + 2 * (th + C) * f32                # biases
            + 2 * tm * C * f32                  # out tile
            + tm * C * f32                      # acc scratch
            + tm * th * f32)                    # f32 intermediate h


# ---------------------------------------------------------------------------
# Public API
# ---------------------------------------------------------------------------

def prepare_ffn_params(w1, b1, w2, b2):
    """One-time parameter prep (do this at init, NOT per call):
    weights -> bf16 MXU operands, biases -> f32."""
    return (w1.astype(jnp.bfloat16), b1.astype(jnp.float32),
            w2.astype(jnp.bfloat16), b2.astype(jnp.float32))


def feed_forward(x, w1, b1, w2, b2, *, tm=512, th=1024):
    """x: (B, T, C) float32.  w1: (C, 4C), b1: (1, 4C), w2: (4C, C), b2: (1, C).
    Weights should be pre-cast to bf16 via prepare_ffn_params (cast here only as
    a fallback so semantics stay correct for f32 callers)."""
    B, T, C = x.shape
    H = w1.shape[1]
    assert w1.shape == (C, H) and w2.shape == (H, C)
    assert b1.shape == (1, H) and b2.shape == (1, C)

    if w1.dtype != jnp.bfloat16:
        w1 = w1.astype(jnp.bfloat16)      # prefer prepare_ffn_params (once, at init)
    if w2.dtype != jnp.bfloat16:
        w2 = w2.astype(jnp.bfloat16)
    b1 = b1.astype(jnp.float32)
    b2 = b2.astype(jnp.float32)

    M = B * T
    x2d = x.reshape(M, C)                 # keep f32; cast to bf16 inside the kernel

    budget = _vmem_budget_bytes()

    # Row tile.
    tm_eff = _pick_row_tile(M, tm)

    # Weight-resident fast path when everything (conservatively estimated with
    # default double-buffering) fits in the VMEM budget.
    resident = _est_vmem_resident(tm_eff, C, H) <= budget
    if not resident:
        th_eff = _pick_hidden_tile(H, th)
        # Auto-shrink the hidden tile, then the row tile, until we fit.
        while _est_vmem_tiled(tm_eff, th_eff, C, H) > budget and th_eff > 128:
            smaller = _pick_hidden_tile(H, th_eff // 2)
            if smaller >= th_eff:
                break
            th_eff = smaller
        while _est_vmem_tiled(tm_eff, th_eff, C, H) > budget and tm_eff > 8:
            tm_eff = max(8, _round_up(tm_eff // 2, 8))

    M_pad = _round_up(M, tm_eff)
    if M_pad != M:
        x2d = jnp.pad(x2d, ((0, M_pad - M), (0, 0)))

    out_dtype = x.dtype

    if resident:
        # Note: constant-index-map blocks (W1/b1/W2/b2) are fetched once by the
        # pipeline; they are left default-buffered for lowering compatibility.
        grid = (M_pad // tm_eff,)
        out2d = pl.pallas_call(
            _ffn_kernel_resident,
            out_shape=jax.ShapeDtypeStruct((M_pad, C), out_dtype),
            grid_spec=pltpu.PrefetchScalarGridSpec(
                num_scalar_prefetch=0,
                grid=grid,
                in_specs=[
                    pl.BlockSpec((tm_eff, C), lambda i: (i, 0)),   # x row tile
                    pl.BlockSpec((C, H), lambda i: (0, 0)),        # W1 (resident)
                    pl.BlockSpec((1, H), lambda i: (0, 0)),        # b1 (resident)
                    pl.BlockSpec((H, C), lambda i: (0, 0)),        # W2 (resident)
                    pl.BlockSpec((1, C), lambda i: (0, 0)),        # b2 (resident)
                ],
                out_specs=pl.BlockSpec((tm_eff, C), lambda i: (i, 0)),
            ),
            compiler_params=pltpu.CompilerParams(
                dimension_semantics=("parallel",),
                vmem_limit_bytes=budget,
            ),
        )(x2d, w1, b1, w2, b2)
    else:
        grid = (M_pad // tm_eff, H // th_eff)
        out2d = pl.pallas_call(
            _ffn_kernel_tiled,
            out_shape=jax.ShapeDtypeStruct((M_pad, C), out_dtype),
            grid_spec=pltpu.PrefetchScalarGridSpec(
                num_scalar_prefetch=0,
                grid=grid,
                in_specs=[
                    pl.BlockSpec((tm_eff, C), lambda i, j: (i, 0)),    # x row tile
                    pl.BlockSpec((C, th_eff), lambda i, j: (0, j)),    # W1 slab
                    pl.BlockSpec((1, th_eff), lambda i, j: (0, j)),    # b1 slab
                    pl.BlockSpec((th_eff, C), lambda i, j: (j, 0)),    # W2 slab
                    pl.BlockSpec((1, C), lambda i, j: (0, 0)),         # b2 (resident)
                ],
                out_specs=pl.BlockSpec((tm_eff, C), lambda i, j: (i, 0)),
                scratch_shapes=[pltpu.VMEM((tm_eff, C), jnp.float32)],
            ),
            compiler_params=pltpu.CompilerParams(
                dimension_semantics=("parallel", "arbitrary"),
                vmem_limit_bytes=budget,
            ),
        )(x2d, w1, b1, w2, b2)

    return out2d[:M].reshape(B, T, C)


def feed_forward_ref(x, w1, b1, w2, b2):
    # Matched-precision reference: same bf16 operand quantization as the kernel,
    # f32 accumulation / bias adds.
    xb = x.astype(jnp.bfloat16).astype(jnp.float32)
    w1b = w1.astype(jnp.bfloat16).astype(jnp.float32)
    w2b = w2.astype(jnp.bfloat16).astype(jnp.float32)
    h = jnp.maximum(xb @ w1b + b1[0].astype(jnp.float32), 0.0)
    hb = h.astype(jnp.bfloat16).astype(jnp.float32)
    return hb @ w2b + b2[0].astype(jnp.float32)


if __name__ == "__main__":
    n_embd = 256
    hidden = 4 * n_embd
    B, T = 2, 8

    key = jax.random.PRNGKey(0)
    kx, k1, k2, k3, k4 = jax.random.split(key, 5)

    # Deterministic synthetic parameters; weights stored transposed as (in, out).
    x = jax.random.normal(kx, (B, T, n_embd), dtype=jnp.float32)
    w1 = jax.random.normal(k1, (n_embd, hidden), dtype=jnp.float32) * 0.02
    b1 = jax.random.normal(k2, (1, hidden), dtype=jnp.float32) * 0.02
    w2 = jax.random.normal(k3, (hidden, n_embd), dtype=jnp.float32) * 0.02
    b2 = jax.random.normal(k4, (1, n_embd), dtype=jnp.float32) * 0.02

    # One-time bf16 cast of weights (outside the per-call hot path).
    w1p, b1p, w2p, b2p = prepare_ffn_params(w1, b1, w2, b2)

    out = feed_forward(x, w1p, b1p, w2p, b2p)
    out = jax.block_until_ready(out)

    ref = feed_forward_ref(x, w1, b1, w2, b2)
    assert out.shape == (B, T, n_embd)
    assert jnp.allclose(out, ref, atol=1e-2, rtol=1e-2), "mismatch vs reference"

    print("KERNEL_OK")
</pallas_src>

<mosaic_0001>
module attributes {stable_mosaic.version = 11 : i64} {
  func.func @_ffn_kernel_resident(%arg0: i32, %arg1: memref<16x256xf32, #tpu.memory_space<vmem>>, %arg2: memref<256x1024xbf16, #tpu.memory_space<vmem>>, %arg3: memref<1x1024xf32, #tpu.memory_space<vmem>>, %arg4: memref<1024x256xbf16, #tpu.memory_space<vmem>>, %arg5: memref<1x256xf32, #tpu.memory_space<vmem>>, %arg6: memref<16x256xf32, #tpu.memory_space<vmem>>) attributes {dimension_semantics = [#tpu.dimension_semantics<parallel>], iteration_bounds = array<i64: 1>, scalar_prefetch = 0 : i64, scratch_operands = 0 : i64, tpu.core_type = #tpu.core_type<tc>, window_params = [{transform_indices = @transform_0, window_bounds = array<i64: 16, 256>}, {pipeline_mode = #tpu.pipeline_mode<synchronous>, transform_indices = @transform_1, window_bounds = array<i64: 256, 1024>}, {pipeline_mode = #tpu.pipeline_mode<synchronous>, transform_indices = @transform_2, window_bounds = array<i64: 1, 1024>}, {pipeline_mode = #tpu.pipeline_mode<synchronous>, transform_indices = @transform_3, window_bounds = array<i64: 1024, 256>}, {pipeline_mode = #tpu.pipeline_mode<synchronous>, transform_indices = @transform_4, window_bounds = array<i64: 1, 256>}, {transform_indices = @transform_5, window_bounds = array<i64: 16, 256>}]} {
    %c0 = arith.constant 0 : index
    %c0_0 = arith.constant 0 : index
    %0 = vector.load %arg1[%c0, %c0_0] : memref<16x256xf32, #tpu.memory_space<vmem>>, vector<16x256xf32>
    %1 = arith.truncf %0 : vector<16x256xf32> to vector<16x256xbf16>
    %c0_1 = arith.constant 0 : index
    %c0_2 = arith.constant 0 : index
    %2 = vector.load %arg2[%c0_1, %c0_2] : memref<256x1024xbf16, #tpu.memory_space<vmem>>, vector<256x1024xbf16>
    %cst = arith.constant dense<0.000000e+00> : vector<16x1024xf32>
    %3 = tpu.matmul %1, %2, %cst {dimension_numbers = #tpu.dot_dimension_numbers<[1], [0], [0], [1], [0, 0, 1, 1], [], []>} : vector<16x256xbf16>, vector<256x1024xbf16>, vector<16x1024xf32> -> vector<16x1024xf32>
    %c0_3 = arith.constant 0 : index
    %c0_4 = arith.constant 0 : index
    %4 = vector.load %arg3[%c0_3, %c0_4] : memref<1x1024xf32, #tpu.memory_space<vmem>>, vector<1x1024xf32>
    %5 = vector.broadcast %4 : vector<1x1024xf32> to vector<16x1024xf32>
    %6 = arith.addf %3, %5 : vector<16x1024xf32>
    %cst_5 = arith.constant 0.000000e+00 : f32
    %7 = vector.broadcast %cst_5 : f32 to vector<16x1024xf32>
    %8 = arith.maximumf %6, %7 : vector<16x1024xf32>
    %9 = arith.truncf %8 : vector<16x1024xf32> to vector<16x1024xbf16>
    %c0_6 = arith.constant 0 : index
    %c0_7 = arith.constant 0 : index
    %10 = vector.load %arg4[%c0_6, %c0_7] : memref<1024x256xbf16, #tpu.memory_space<vmem>>, vector<1024x256xbf16>
    %cst_8 = arith.constant dense<0.000000e+00> : vector<16x256xf32>
    %11 = tpu.matmul %9, %10, %cst_8 {dimension_numbers = #tpu.dot_dimension_numbers<[1], [0], [0], [1], [0, 0, 1, 1], [], []>} : vector<16x1024xbf16>, vector<1024x256xbf16>, vector<16x256xf32> -> vector<16x256xf32>
    %c0_9 = arith.constant 0 : index
    %c0_10 = arith.constant 0 : index
    %12 = vector.load %arg5[%c0_9, %c0_10] : memref<1x256xf32, #tpu.memory_space<vmem>>, vector<1x256xf32>
    %13 = vector.broadcast %12 : vector<1x256xf32> to vector<16x256xf32>
    %14 = arith.addf %11, %13 : vector<16x256xf32>
    %c0_11 = arith.constant 0 : index
    %c0_12 = arith.constant 0 : index
    %15 = vector.load %arg6[%c0_11, %c0_12] : memref<16x256xf32, #tpu.memory_space<vmem>>, vector<16x256xf32>
    tpu.vector_store %arg6[%c0_11, %c0_12], %14 {strides = array<i32>} : memref<16x256xf32, #tpu.memory_space<vmem>>, vector<16x256xf32>,
    return
  }
  func.func @transform_0(%arg0: i32) -> (i32, i32) {
    %c0_i32 = arith.constant 0 : i32
    %c0_i32_0 = arith.constant 0 : i32
    return %arg0, %c0_i32 : i32, i32
  }
  func.func @transform_1(%arg0: i32) -> (i32, i32) {
    %c0_i32 = arith.constant 0 : i32
    %c0_i32_0 = arith.constant 0 : i32
    %c0_i32_1 = arith.constant 0 : i32
    return %c0_i32, %c0_i32_0 : i32, i32
  }
  func.func @transform_2(%arg0: i32) -> (i32, i32) {
    %c0_i32 = arith.constant 0 : i32
    %c0_i32_0 = arith.constant 0 : i32
    %c0_i32_1 = arith.constant 0 : i32
    return %c0_i32, %c0_i32_0 : i32, i32
  }
  func.func @transform_3(%arg0: i32) -> (i32, i32) {
    %c0_i32 = arith.constant 0 : i32
    %c0_i32_0 = arith.constant 0 : i32
    %c0_i32_1 = arith.constant 0 : i32
    return %c0_i32, %c0_i32_0 : i32, i32
  }
  func.func @transform_4(%arg0: i32) -> (i32, i32) {
    %c0_i32 = arith.constant 0 : i32
    %c0_i32_0 = arith.constant 0 : i32
    %c0_i32_1 = arith.constant 0 : i32
    return %c0_i32, %c0_i32_0 : i32, i32
  }
  func.func @transform_5(%arg0: i32) -> (i32, i32) {
    %c0_i32 = arith.constant 0 : i32
    %c0_i32_0 = arith.constant 0 : i32
    return %arg0, %c0_i32 : i32, i32
  }
}

</mosaic_0001>

<bundles_post_ra>
// kernel: tpu_custom_call.1
= control target key start
LH: loop header
LB: loop body
LE: loop exit
PB: predicated region body
PF: predicated region fallthrough
CT: control target
= control target key end

     0   :  { %10 = vsyncpa [#allocation3], 0  ;;  %s2811_s0 = inlined_call_operand.hbm [shape: f32[16,256], index: 0, kind: input, shape index: {}]   ;;  %s2812_s1 = inlined_call_operand.hbm [shape: bf16[256,1024], index: 1, kind: input, shape index: {}]   ;;  %s2813_s2 = inlined_call_operand.hbm [shape: f32[1,1024], index: 2, kind: input, shape index: {}]   ;;  %s2814_s3 = inlined_call_operand.hbm [shape: bf16[1024,256], index: 3, kind: input, shape index: {}]   ;;  %s2815_s4 = inlined_call_operand.vmem [shape: f32[1,256], index: 4, kind: input, shape index: {}]   ;;  %s2816_s5 = inlined_call_operand.hbm [shape: f32[16,256], index: 5, kind: output, shape index: {}]  }
   0x1   :  { %11 = vsyncpa [#allocation6], 0 }
   0x2   :  { %12 = vsyncpa [#allocation9], 0 }
   0x3   :  { %13 = vsyncpa [#allocation4], 0  ;;  %s2654_s18 = smov [#allocation5]   ;;  %s2536_s22 = scalar_lea.hbm %s2812_s1, 16384 }
   0x4   :  { %s31_s19 = sshll.u32 %s2654_s18, 4  ;;  %p2537_p0 = scmp.ne.s32.totalorder %s2812_s1, %s2536_s22  ;;  %s32_s19 = int_to_ptr.vmem [resolvable:$true] %s31_s19 }
   0x5   :  { %p2540_p1 = scmp.lt.u32.totalorder %s2536_s22, %s2812_s1 }
   0x7   :  { %p2542_p2 = pnand %p2540_p1, %p2537_p0 }
   0x9   :  { %2545 = shalt.err (!%p2542_p2)
}
   0xa   :  { %s2546_s27 = scalar_lea.vmem %s32_s19, 16384  ;;  %p2551_p4 = scmp.lt.s32.totalorder %s32_s19, %s32_s19 }
   0xb   :  { %p2547_p3 = scmp.ne.s32.totalorder %s32_s19, %s2546_s27  ;;  %p2552_p5 = scmp.lt.s32.totalorder %s2546_s27, %s2546_s27 }
   0xd   :  { %p2553_p6 = por %p2552_p5, %p2551_p4 }
   0xf   :  { %p2554_p7 = pnand %p2553_p6, %p2547_p3 }
  0x11   :  { %2557 = shalt.err (!%p2554_p7)
}
  0x12   :  { %s2655_s28 = smov 512   ;;  %s2656_s29 = smov 32  }
  0x13   :  { %37 = dma.hbm_to_vmem [thread:$0]  %s2812_s1, 16384, %s32_s19, [#allocation6], %s2655_s28, %s2655_s28, %s2656_s29  }
  0x14   :  { %s2657_s7 = smov [#allocation2]   ;;  %s2558_s11 = scalar_lea.hbm %s2811_s0, 512 }
  0x15   :  { %s19_s8 = sshll.u32 %s2657_s7, 4  ;;  %p2559_p8 = scmp.ne.s32.totalorder %s2811_s0, %s2558_s11  ;;  %s20_s8 = int_to_ptr.vmem [resolvable:$true] %s19_s8 }
  0x16   :  { %p2562_p9 = scmp.lt.u32.totalorder %s2558_s11, %s2811_s0 }
  0x18   :  { %p2564_p10 = pnand %p2562_p9, %p2559_p8 }
  0x1a   :  { %2567 = shalt.err (!%p2564_p10)
}
  0x1b   :  { %s2568_s16 = scalar_lea.vmem %s20_s8, 512  ;;  %p2573_p12 = scmp.lt.s32.totalorder %s20_s8, %s20_s8 }
  0x1c   :  { %p2569_p11 = scmp.ne.s32.totalorder %s20_s8, %s2568_s16  ;;  %p2574_p13 = scmp.lt.s32.totalorder %s2568_s16, %s2568_s16 }
  0x1e   :  { %p2575_p0 = por %p2574_p13, %p2573_p12 }
  0x20   :  { %p2576_p1 = pnand %p2575_p0, %p2569_p11 }
  0x22   :  { %2579 = shalt.err (!%p2576_p1)
}
  0x23   :  { %s2658_s1 = smov 256   ;;  %s2659_s17 = smov 16  }
  0x24   :  { %25 = dma.hbm_to_vmem [thread:$0]  %s2811_s0, 512, %s20_s8, [#allocation3], %s2658_s1, %s2658_s1, %s2659_s17  }
  0x25   :  { %s2660_s20 = smov [#allocation7]   ;;  %s2661_s22 = smov [#allocation8]  }
  0x26   :  { %s44_s21 = sshll.u32 %s2660_s20, 4  ;;  %s53_s23 = sshll.u32 %s2661_s22, 4  ;;  %s45_s21 = int_to_ptr.vmem [resolvable:$true] %s44_s21  ;;  %s2722_s23 = int_to_ptr.vmem [resolvable:$true] %s53_s23 }
  0x27   :  { %s2580_s26 = scalar_lea.hbm %s2813_s2, 128 }
  0x28   :  { %p2581_p2 = scmp.ne.s32.totalorder %s2813_s2, %s2580_s26  ;;  %p2584_p3 = scmp.lt.u32.totalorder %s2580_s26, %s2813_s2 }
  0x2a   :  { %p2586_p4 = pnand %p2584_p3, %p2581_p2 }
  0x2c   :  { %2589 = shalt.err (!%p2586_p4)
}
  0x2d   :  { %s2590_s0 = scalar_lea.vmem %s45_s21, 128  ;;  %p2595_p6 = scmp.lt.s32.totalorder %s45_s21, %s45_s21 }
  0x2e   :  { %p2591_p5 = scmp.ne.s32.totalorder %s45_s21, %s2590_s0  ;;  %p2596_p7 = scmp.lt.s32.totalorder %s2590_s0, %s2590_s0 }
  0x30   :  { %p2597_p8 = por %p2596_p7, %p2595_p6 }
  0x32   :  { %p2598_p9 = pnand %p2597_p8, %p2591_p5 }
  0x34   :  { %2601 = shalt.err (!%p2598_p9)
}
  0x35   :  { %47 = dma.hbm_to_vmem [thread:$0]  %s2813_s2, 128, %s45_s21, [#allocation6]  }
  0x36   :  { %s2602_s10 = scalar_lea.hbm %s2814_s3, 16384 }
  0x37   :  { %p2603_p10 = scmp.ne.s32.totalorder %s2814_s3, %s2602_s10  ;;  %p2606_p11 = scmp.lt.u32.totalorder %s2602_s10, %s2814_s3 }
  0x39   :  { %p2608_p12 = pnand %p2606_p11, %p2603_p10 }
  0x3b   :  { %2611 = shalt.err (!%p2608_p12)
}
  0x3c   :  { %s2612_s15 = scalar_lea.vmem %s2722_s23, 16384  ;;  %p2617_p0 = scmp.lt.s32.totalorder %s2722_s23, %s2722_s23 }
  0x3d   :  { %p2613_p13 = scmp.ne.s32.totalorder %s2722_s23, %s2612_s15  ;;  %p2618_p1 = scmp.lt.s32.totalorder %s2612_s15, %s2612_s15 }
  0x3f   :  { %p2619_p2 = por %p2618_p1, %p2617_p0 }
  0x41   :  { %p2620_p3 = pnand %p2619_p2, %p2613_p13 }
  0x43   :  { %2623 = shalt.err (!%p2620_p3)
}
  0x44   :  { %s2662_s2 = smov 128   ;;  %s2663_s16 = smov 8  }
  0x45   :  { %59 = dma.hbm_to_vmem [thread:$0]  %s2814_s3, 16384, %s2722_s23, [#allocation9], %s2662_s2, %s2662_s2, %s2663_s16  }
  0x46   :  { %2646 = dma.done.wait [#allocation3], 512  }
  0x47   :  { %2647 = vsyncadd [#allocation3], 4294966784 }
  0x48   :  { %2648 = dma.done.wait [#allocation6], 16512  }
  0x49   :  { %2649 = vsyncadd [#allocation6], 4294950784 }
  0x4a   :  { %2650 = dma.done.wait [#allocation9], 16384  }
  0x4b   :  { %2651 = vsyncadd [#allocation9], 4294950912  ;;  %v80_v0 = vld [vmem:[#allocation5] sm:$0xff]  ;;  %v75_v17 = vld [vmem:[#allocation2 + $0x8] sm:$0xff]  ;;  %s2664_s21 = smov [#allocation10]  }
  0x4c   :  { %v84_v1 = vld [vmem:[#allocation5 + $0x20] sm:$0xff]  ;;  %v77_v18 = vld [vmem:[#allocation2 + $0x18] sm:$0xff]  ;;  %s2047_s22 = sshll.u32 %s2664_s21, 4  ;;  %s2048_s22 = int_to_ptr.vmem [resolvable:$true] %s2047_s22 }
  0x4d   :  { %v88_v2 = vld [vmem:[#allocation5 + $0x40] sm:$0xff]  ;;  %v2062_v3 = vcombine.high %v80_v0, %v84_v1  ;;  %v2061_v4 = vcombine.low %v80_v0, %v84_v1  ;;  %v2753_v20 = vpack.c.bf16 %v77_v18, %v75_v17  ;;  %v81_v1 = vld [vmem:[#allocation5 + $0x8] sm:$0xff]  ;;  %p2629_p5 = scmp.lt.s32.totalorder %s2048_s22, %s2048_s22 }
  0x4e   :  { %v92_v5 = vld [vmem:[#allocation5 + $0x60] sm:$0xff]  ;;  %v109_v17 = vld [vmem:[#allocation5 + $0xe8] sm:$0xff] }
  0x4f   :  { %v2070_v6 = vcombine.high %v88_v2, %v92_v5  ;;  %v96_v7 = vld [vmem:[#allocation5 + $0x80] sm:$0xff]  ;;  %890 = vmatprep.subr.bf16.mxu1 %v2062_v3  ;;  %v2069_v9 = vcombine.low %v88_v2, %v92_v5  ;;  %922 = vmatprep.mubr.bf16.mxu1 %v2753_v20  ;;  %v85_v2 = vld [vmem:[#allocation5 + $0x28] sm:$0xff]  ;;  %v76_v5 = vld [vmem:[#allocation2 + $0x10] sm:$0xff] }
  0x50   :  { %v100_v8 = vld [vmem:[#allocation5 + $0xa0] sm:$0xff]  ;;  %891 = vmatpush1.bf16.msra.mxu1 %v2061_v4 }
  0x51   :  { %892 = vmatprep.subr.bf16.mxu1 %v2070_v6  ;;  %v2078_v10 = vcombine.high %v96_v7, %v100_v8  ;;  %v104_v11 = vld [vmem:[#allocation5 + $0xc0] sm:$0xff]  ;;  %v2077_v13 = vcombine.low %v96_v7, %v100_v8  ;;  %v89_v7 = vld [vmem:[#allocation5 + $0x48] sm:$0xff] }
  0x52   :  { %v108_v12 = vld [vmem:[#allocation5 + $0xe0] sm:$0xff]  ;;  %v93_v8 = vld [vmem:[#allocation5 + $0x68] sm:$0xff] }
  0x53   :  { %v2086_v14 = vcombine.high %v104_v11, %v108_v12  ;;  %v112_v15 = vld [vmem:[#allocation5 + $0x100] sm:$0xff]  ;;  %v2085_v19 = vcombine.low %v104_v11, %v108_v12  ;;  %v2063_v11 = vcombine.low %v81_v1, %v85_v2  ;;  %v97_v12 = vld [vmem:[#allocation5 + $0x88] sm:$0xff] }
  0x54   :  { %893 = vmatpush1.bf16.msra.mxu1 %v2069_v9  ;;  %v116_v16 = vld [vmem:[#allocation5 + $0x120] sm:$0xff]  ;;  %v2064_v9 = vcombine.high %v81_v1, %v85_v2  ;;  %v185_v2 = vld [vmem:[#allocation5 + $0x348] sm:$0xff] }
  0x55   :  { %894 = vmatprep.subr.bf16.mxu1 %v2078_v10  ;;  %v2094_v21 = vcombine.high %v112_v15, %v116_v16  ;;  %v120_v22 = vld [vmem:[#allocation5 + $0x140] sm:$0xff]  ;;  %v2093_v24 = vcombine.low %v112_v15, %v116_v16  ;;  %v2071_v15 = vcombine.low %v89_v7, %v93_v8  ;;  %v105_v16 = vld [vmem:[#allocation5 + $0xc8] sm:$0xff] }
  0x56   :  { %v124_v23 = vld [vmem:[#allocation5 + $0x160] sm:$0xff] }
  0x57   :  { %v2102_v25 = vcombine.high %v120_v22, %v124_v23  ;;  %v128_v26 = vld [vmem:[#allocation5 + $0x180] sm:$0xff]  ;;  %v2101_v28 = vcombine.low %v120_v22, %v124_v23  ;;  %v117_v22 = vld [vmem:[#allocation5 + $0x128] sm:$0xff]  ;;  %v2088_v23 = vcombine.high %v105_v16, %v109_v17 }
  0x58   :  { %895 = vmatpush1.bf16.msra.mxu1 %v2077_v13  ;;  %v132_v27 = vld [vmem:[#allocation5 + $0x1a0] sm:$0xff]  ;;  %v101_v13 = vld [vmem:[#allocation5 + $0xa8] sm:$0xff] }
  0x59   :  { %896 = vmatprep.subr.bf16.mxu1 %v2086_v14  ;;  %v2110_v29 = vcombine.high %v128_v26, %v132_v27  ;;  %v136_v30 = vld [vmem:[#allocation5 + $0x1c0] sm:$0xff]  ;;  %v2109_v32 = vcombine.low %v128_v26, %v132_v27  ;;  %v2072_v14 = vcombine.high %v89_v7, %v93_v8  ;;  %v2080_v18 = vcombine.high %v97_v12, %v101_v13  ;;  %v125_v27 = vld [vmem:[#allocation5 + $0x168] sm:$0xff] }
  0x5a   :  { %v140_v31 = vld [vmem:[#allocation5 + $0x1e0] sm:$0xff]  ;;  %v193_v8 = vld [vmem:[#allocation5 + $0x388] sm:$0xff] }
  0x5b   :  { %v2118_v33 = vcombine.high %v136_v30, %v140_v31  ;;  %v144_v34 = vld [vmem:[#allocation5 + $0x200] sm:$0xff]  ;;  %v2117_v36 = vcombine.low %v136_v30, %v140_v31  ;;  %v129_v30 = vld [vmem:[#allocation5 + $0x188] sm:$0xff] }
  0x5c   :  { %897 = vmatpush1.bf16.msra.mxu1 %v2085_v19  ;;  %v148_v35 = vld [vmem:[#allocation5 + $0x220] sm:$0xff]  ;;  %v2079_v19 = vcombine.low %v97_v12, %v101_v13  ;;  %v133_v31 = vld [vmem:[#allocation5 + $0x1a8] sm:$0xff] }
  0x5d   :  { %898 = vmatprep.subr.bf16.mxu1 %v2094_v21  ;;  %v152_v37 = vld [vmem:[#allocation5 + $0x240] sm:$0xff]  ;;  %v2126_v39 = vcombine.high %v144_v34, %v148_v35  ;;  %v2125_v40 = vcombine.low %v144_v34, %v148_v35  ;;  %v113_v21 = vld [vmem:[#allocation5 + $0x108] sm:$0xff] }
  0x5e   :  { %v156_v38 = vld [vmem:[#allocation5 + $0x260] sm:$0xff]  ;;  %v2096_v26 = vcombine.high %v113_v21, %v117_v22  ;;  %v137_v34 = vld [vmem:[#allocation5 + $0x1c8] sm:$0xff] }
  0x5f   :  { %v160_v41 = vld [vmem:[#allocation5 + $0x280] sm:$0xff]  ;;  %v2134_v43 = vcombine.high %v152_v37, %v156_v38  ;;  %v2133_v44 = vcombine.low %v152_v37, %v156_v38  ;;  %v141_v35 = vld [vmem:[#allocation5 + $0x1e8] sm:$0xff] }
  0x60   :  { %899 = vmatpush1.bf16.msra.mxu1 %v2093_v24  ;;  %v164_v42 = vld [vmem:[#allocation5 + $0x2a0] sm:$0xff]  ;;  %v2087_v24 = vcombine.low %v105_v16, %v109_v17  ;;  %v2120_v37 = vcombine.high %v137_v34, %v141_v35  ;;  %v145_v38 = vld [vmem:[#allocation5 + $0x208] sm:$0xff] }
  0x61   :  { %900 = vmatprep.subr.bf16.mxu1 %v2102_v25  ;;  %v168_v45 = vld [vmem:[#allocation5 + $0x2c0] sm:$0xff]  ;;  %v2142_v47 = vcombine.high %v160_v41, %v164_v42  ;;  %v2141_v48 = vcombine.low %v160_v41, %v164_v42  ;;  %v121_v25 = vld [vmem:[#allocation5 + $0x148] sm:$0xff] }
  0x62   :  { %v172_v46 = vld [vmem:[#allocation5 + $0x2e0] sm:$0xff]  ;;  %v153_v42 = vld [vmem:[#allocation5 + $0x248] sm:$0xff] }
  0x63   :  { %v176_v49 = vld [vmem:[#allocation5 + $0x300] sm:$0xff]  ;;  %v2150_v51 = vcombine.high %v168_v45, %v172_v46  ;;  %v2149_v52 = vcombine.low %v168_v45, %v172_v46  ;;  %v2346_v46 = vld [vmem:[#allocation8] ss:$8 sps:$4 sm:$0xff]   ;;  %v2362_v17 = vld [vmem:[#allocation8 + $0x64] ss:$8 sps:$4 sm:$0xff]  }
  0x64   :  { %901 = vmatpush1.bf16.msra.mxu1 %v2101_v28  ;;  %v180_v50 = vld [vmem:[#allocation5 + $0x320] sm:$0xff]  ;;  %v2095_v28 = vcombine.low %v113_v21, %v117_v22  ;;  %v205_v16 = vld [vmem:[#allocation5 + $0x3e8] sm:$0xff]  ;;  %v82_v22 = vld [vmem:[#allocation5 + $0x10] sm:$0xff] }
  0x65   :  { %902 = vmatprep.subr.bf16.mxu1 %v2110_v29  ;;  %v184_v53 = vld [vmem:[#allocation5 + $0x340] sm:$0xff]  ;;  %v2158_v55 = vcombine.high %v176_v49, %v180_v50  ;;  %v2157_v56 = vcombine.low %v176_v49, %v180_v50  ;;  %v2104_v29 = vcombine.high %v121_v25, %v125_v27  ;;  %v165_v49 = vld [vmem:[#allocation5 + $0x2a8] sm:$0xff] }
  0x66   :  { %v188_v54 = vld [vmem:[#allocation5 + $0x360] sm:$0xff] }
  0x67   :  { %v192_v57 = vld [vmem:[#allocation5 + $0x380] sm:$0xff]  ;;  %v2166_v59 = vcombine.high %v184_v53, %v188_v54  ;;  %v2165_v60 = vcombine.low %v184_v53, %v188_v54  ;;  %v169_v54 = vld [vmem:[#allocation5 + $0x2c8] sm:$0xff] }
  0x68   :  { %903 = vmatpush1.bf16.msra.mxu1 %v2109_v32  ;;  %v196_v58 = vld [vmem:[#allocation5 + $0x3a0] sm:$0xff]  ;;  %v2103_v32 = vcombine.low %v121_v25, %v125_v27 }
  0x69   :  { %904 = vmatprep.subr.bf16.mxu1 %v2118_v33  ;;  %v200_v61 = vld [vmem:[#allocation5 + $0x3c0] sm:$0xff]  ;;  %v2174_v63 = vcombine.high %v192_v57, %v196_v58  ;;  %v2173_v0 = vcombine.low %v192_v57, %v196_v58  ;;  %v2112_v33 = vcombine.high %v129_v30, %v133_v31  ;;  %v2352_v58 = vld [vmem:[#allocation8 + $0x20] ss:$8 sps:$4 sm:$0xff]  }
  0x6a   :  { %v204_v62 = vld [vmem:[#allocation5 + $0x3e0] sm:$0xff] }
  0x6b   :  { %v2182_v3 = vcombine.high %v200_v61, %v204_v62  ;;  %v74_v4 = vld [vmem:[#allocation2] sm:$0xff]  ;;  %v2181_v6 = vcombine.low %v200_v61, %v204_v62  ;;  %v181_v61 = vld [vmem:[#allocation5 + $0x328] sm:$0xff] }
  0x6c   :  { %905 = vmatpush1.bf16.msra.mxu1 %v2117_v36  ;;  %v2756_v10 = vpack.c.bf16 %v76_v5, %v74_v4  ;;  %v2111_v36 = vcombine.low %v129_v30, %v133_v31  ;;  %v2347_v50 = vld [vmem:[#allocation8 + $0x14] ss:$8 sps:$4 sm:$0xff]   ;;  %v2356_v4 = vld [vmem:[#allocation8 + $0x44] ss:$8 sps:$4 sm:$0xff]   ;;  %v2361_v13 = vld [vmem:[#allocation8 + $0x50] ss:$8 sps:$4 sm:$0xff]  }
  0x6d   :  { %906 = vmatprep.subr.bf16.mxu1 %v2126_v39  ;;  %v149_v39 = vld [vmem:[#allocation5 + $0x228] sm:$0xff]  ;;  %v2353_v62 = vld [vmem:[#allocation8 + $0x34] ss:$8 sps:$4 sm:$0xff]  }
  0x6e   :  { %v2128_v41 = vcombine.high %v145_v38, %v149_v39  ;;  %v2127_v45 = vcombine.low %v145_v38, %v149_v39  ;;  %v2368_v30 = vld [vmem:[#allocation8 + $0x84] ss:$8 sps:$4 sm:$0xff]  }
  0x6f   :  { %v2374_v38 = vld [vmem:[#allocation8 + $0xa4] ss:$8 sps:$4 sm:$0xff]  }
  0x70   :  { %907 = vmatpush1.bf16.msra.mxu1 %v2125_v40  ;;  %v2119_v40 = vcombine.low %v137_v34, %v141_v35  ;;  %v98_v34 = vld [vmem:[#allocation5 + $0x90] sm:$0xff] }
  0x71   :  { %908 = vmatprep.subr.bf16.mxu1 %v2134_v43  ;;  %v157_v43 = vld [vmem:[#allocation5 + $0x268] sm:$0xff]  ;;  %v102_v35 = vld [vmem:[#allocation5 + $0xb0] sm:$0xff] }
  0x74   :  { %909 = vmatpush1.bf16.msra.mxu1 %v2133_v44  ;;  %v2344_v44 = vld [vmem:[#allocation8 + $0x4] ss:$8 sps:$4 sm:$0xff]  }
  0x75   :  { %910 = vmatprep.subr.bf16.mxu1 %v2142_v47  ;;  %v2136_v47 = vcombine.high %v153_v42, %v157_v43  ;;  %1866 = vmatprep.subr.bf16.mxu0 %v2344_v44  ;;  %v2377_v44 = vld [vmem:[#allocation8 + $0xb4] ss:$8 sps:$4 sm:$0xff]  }
  0x76   :  { %1867 = vmatpush1.bf16.msra.mxu0 %v2346_v46 }
  0x77   :  { %1868 = vmatprep.subr.bf16.mxu0 %v2347_v50  ;;  %v2380_v50 = vld [vmem:[#allocation8 + $0xc4] ss:$8 sps:$4 sm:$0xff]  }
  0x78   :  { %911 = vmatpush1.bf16.msra.mxu1 %v2141_v48  ;;  %v161_v48 = vld [vmem:[#allocation5 + $0x288] sm:$0xff] }
  0x79   :  { %912 = vmatprep.subr.bf16.mxu1 %v2150_v51  ;;  %v2135_v51 = vcombine.low %v153_v42, %v157_v43  ;;  %v2144_v53 = vcombine.high %v161_v48, %v165_v49  ;;  %v2143_v57 = vcombine.low %v161_v48, %v165_v49  ;;  %v110_v42 = vld [vmem:[#allocation5 + $0xf0] sm:$0xff]  ;;  %v2379_v49 = vld [vmem:[#allocation8 + $0xb0] ss:$8 sps:$4 sm:$0xff]  }
  0x7a   :  { %v2376_v43 = vld [vmem:[#allocation8 + $0xa0] ss:$8 sps:$4 sm:$0xff]  }
  0x7b   :  { %v118_v48 = vld [vmem:[#allocation5 + $0x130] sm:$0xff] }
  0x7c   :  { %913 = vmatpush1.bf16.msra.mxu1 %v2149_v52  ;;  %v2349_v52 = vld [vmem:[#allocation8 + $0x10] ss:$8 sps:$4 sm:$0xff]  }
  0x7d   :  { %914 = vmatprep.subr.bf16.mxu1 %v2158_v55  ;;  %v173_v55 = vld [vmem:[#allocation5 + $0x2e8] sm:$0xff]  ;;  %1869 = vmatpush1.bf16.msra.mxu0 %v2349_v52 }
  0x80   :  { %915 = vmatpush1.bf16.msra.mxu1 %v2157_v56  ;;  %v2350_v56 = vld [vmem:[#allocation8 + $0x24] ss:$8 sps:$4 sm:$0xff]  }
  0x81   :  { %916 = vmatprep.subr.bf16.mxu1 %v2166_v59  ;;  %v2152_v59 = vcombine.high %v169_v54, %v173_v55  ;;  %1870 = vmatprep.subr.bf16.mxu0 %v2350_v56  ;;  %v2383_v56 = vld [vmem:[#allocation8 + $0xd4] ss:$8 sps:$4 sm:$0xff]  }
  0x82   :  { %1871 = vmatpush1.bf16.msra.mxu0 %v2352_v58 }
  0x83   :  { %1872 = vmatprep.subr.bf16.mxu0 %v2353_v62  ;;  %v2385_v62 = vld [vmem:[#allocation8 + $0xd0] ss:$8 sps:$4 sm:$0xff]  }
  0x84   :  { %917 = vmatpush1.bf16.msra.mxu1 %v2165_v60  ;;  %v177_v60 = vld [vmem:[#allocation5 + $0x308] sm:$0xff] }
  0x85   :  { %918 = vmatprep.subr.bf16.mxu1 %v2174_v63  ;;  %v2151_v63 = vcombine.low %v169_v54, %v173_v55  ;;  %v2160_v1 = vcombine.high %v177_v60, %v181_v61  ;;  %v2159_v5 = vcombine.low %v177_v60, %v181_v61  ;;  %v126_v54 = vld [vmem:[#allocation5 + $0x170] sm:$0xff] }
  0x86   :  { %v2382_v55 = vld [vmem:[#allocation8 + $0xc0] ss:$8 sps:$4 sm:$0xff]  }
  0x87   :  { %v134_v60 = vld [vmem:[#allocation5 + $0x1b0] sm:$0xff] }
  0x88   :  { %919 = vmatpush1.bf16.msra.mxu1 %v2173_v0  ;;  %v2355_v0 = vld [vmem:[#allocation8 + $0x30] ss:$8 sps:$4 sm:$0xff]  }
  0x89   :  { %920 = vmatprep.subr.bf16.mxu1 %v2182_v3  ;;  %v189_v3 = vld [vmem:[#allocation5 + $0x368] sm:$0xff]  ;;  %1873 = vmatpush1.bf16.msra.mxu0 %v2355_v0  ;;  %v138_v0 = vld [vmem:[#allocation5 + $0x1d0] sm:$0xff] }
  0x8a   :  { %v2168_v7 = vcombine.high %v185_v2, %v189_v3  ;;  %1874 = vmatprep.subr.bf16.mxu0 %v2356_v4  ;;  %v2167_v12 = vcombine.low %v185_v2, %v189_v3  ;;  %v2386_v2 = vld [vmem:[#allocation8 + $0xe4] ss:$8 sps:$4 sm:$0xff]   ;;  %v2388_v4 = vld [vmem:[#allocation8 + $0xe0] ss:$8 sps:$4 sm:$0xff]  }
  0x8c   :  { %921 = vmatpush1.bf16.msra.mxu1 %v2181_v6  ;;  %v2358_v6 = vld [vmem:[#allocation8 + $0x40] ss:$8 sps:$4 sm:$0xff]  }
  0x8d   :  { %933 = vmatprep.subr.bf16.mxu1 %v2064_v9  ;;  %v197_v9 = vld [vmem:[#allocation5 + $0x3a8] sm:$0xff]  ;;  %1875 = vmatpush1.bf16.msra.mxu0 %v2358_v6  ;;  %v146_v6 = vld [vmem:[#allocation5 + $0x210] sm:$0xff] }
  0x8f   :  { %923 = vmatmul.mubr.bf16.vlgmr.msra.gmra.mrb[0].mxu1 %v2756_v10 }
  0x90   :  { %934 = vmatpush1.bf16.msra.mxu1 %v2063_v11  ;;  %965 = vmatprep.mubr.bf16.mxu1 %v2753_v20  ;;  %v2359_v11 = vld [vmem:[#allocation8 + $0x54] ss:$8 sps:$4 sm:$0xff]  }
  0x91   :  { %935 = vmatprep.subr.bf16.mxu1 %v2072_v14  ;;  %v2176_v14 = vcombine.high %v193_v8, %v197_v9  ;;  %1876 = vmatprep.subr.bf16.mxu0 %v2359_v11  ;;  %v2391_v11 = vld [vmem:[#allocation8 + $0xf0] ss:$8 sps:$4 sm:$0xff]  }
  0x92   :  { %1877 = vmatpush1.bf16.msra.mxu0 %v2361_v13  ;;  %v154_v13 = vld [vmem:[#allocation5 + $0x250] sm:$0xff] }
  0x93   :  { %1878 = vmatprep.subr.bf16.mxu0 %v2362_v17 }
  0x94   :  { %936 = vmatpush1.bf16.msra.mxu1 %v2071_v15  ;;  %v201_v15 = vld [vmem:[#allocation5 + $0x3c8] sm:$0xff] }
  0x95   :  { %937 = vmatprep.subr.bf16.mxu1 %v2080_v18  ;;  %v2175_v18 = vcombine.low %v193_v8, %v197_v9  ;;  %v2184_v21 = vcombine.high %v201_v15, %v205_v16  ;;  %v2183_v25 = vcombine.low %v201_v15, %v205_v16  ;;  %v2389_v8 = vld [vmem:[#allocation8 + $0xf4] ss:$8 sps:$4 sm:$0xff]   ;;  %v2394_v15 = vld [vmem:[#allocation8 + $0x104] ss:$8 sps:$4 sm:$0xff]  }
  0x98   :  { %938 = vmatpush1.bf16.msra.mxu1 %v2079_v19  ;;  %v2364_v19 = vld [vmem:[#allocation8 + $0x60] ss:$8 sps:$4 sm:$0xff]  }
  0x99   :  { %939 = vmatprep.subr.bf16.mxu1 %v2088_v23  ;;  %v86_v23 = vld [vmem:[#allocation5 + $0x30] sm:$0xff]  ;;  %1879 = vmatpush1.bf16.msra.mxu0 %v2364_v19 }
  0x9a   :  { %v2066_v27 = vcombine.high %v82_v22, %v86_v23  ;;  %v2065_v31 = vcombine.low %v82_v22, %v86_v23  ;;  %v166_v19 = vld [vmem:[#allocation5 + $0x2b0] sm:$0xff] }
  0x9b   :  { %v170_v23 = vld [vmem:[#allocation5 + $0x2d0] sm:$0xff] }
  0x9c   :  { %940 = vmatpush1.bf16.msra.mxu1 %v2087_v24  ;;  %v2365_v24 = vld [vmem:[#allocation8 + $0x74] ss:$8 sps:$4 sm:$0xff]  }
  0x9d   :  { %941 = vmatprep.subr.bf16.mxu1 %v2096_v26  ;;  %v2367_v26 = vld [vmem:[#allocation8 + $0x70] ss:$8 sps:$4 sm:$0xff]   ;;  %1880 = vmatprep.subr.bf16.mxu0 %v2365_v24  ;;  %v174_v24 = vld [vmem:[#allocation5 + $0x2f0] sm:$0xff] }
  0x9e   :  { %1881 = vmatpush1.bf16.msra.mxu0 %v2367_v26  ;;  %v2154_v26 = vcombine.high %v170_v23, %v174_v24 }
  0x9f   :  { %1882 = vmatprep.subr.bf16.mxu0 %v2368_v30 }
  0xa0   :  { %942 = vmatpush1.bf16.msra.mxu1 %v2095_v28  ;;  %v90_v28 = vld [vmem:[#allocation5 + $0x50] sm:$0xff] }
  0xa1   :  { %943 = vmatprep.subr.bf16.mxu1 %v2104_v29  ;;  %v94_v29 = vld [vmem:[#allocation5 + $0x70] sm:$0xff] }
  0xa2   :  { %v2073_v39 = vcombine.low %v90_v28, %v94_v29 }
  0xa4   :  { %944 = vmatpush1.bf16.msra.mxu1 %v2103_v32  ;;  %v2370_v32 = vld [vmem:[#allocation8 + $0x80] ss:$8 sps:$4 sm:$0xff]  }
  0xa5   :  { %945 = vmatprep.subr.bf16.mxu1 %v2112_v33  ;;  %v2074_v33 = vcombine.high %v90_v28, %v94_v29  ;;  %1883 = vmatpush1.bf16.msra.mxu0 %v2370_v32  ;;  %v182_v28 = vld [vmem:[#allocation5 + $0x330] sm:$0xff]  ;;  %v2153_v29 = vcombine.low %v170_v23, %v174_v24  ;;  %v171_v24 = vld [vmem:[#allocation5 + $0x2d8] sm:$0xff] }
  0xa6   :  { %v190_v32 = vld [vmem:[#allocation5 + $0x370] sm:$0xff] }
  0xa8   :  { %946 = vmatpush1.bf16.msra.mxu1 %v2111_v36  ;;  %v2371_v36 = vld [vmem:[#allocation8 + $0x94] ss:$8 sps:$4 sm:$0xff]  }
  0xa9   :  { %947 = vmatprep.subr.bf16.mxu1 %v2120_v37  ;;  %v2373_v37 = vld [vmem:[#allocation8 + $0x90] ss:$8 sps:$4 sm:$0xff]   ;;  %1884 = vmatprep.subr.bf16.mxu0 %v2371_v36  ;;  %v198_v36 = vld [vmem:[#allocation5 + $0x3b0] sm:$0xff] }
  0xaa   :  { %1885 = vmatpush1.bf16.msra.mxu0 %v2373_v37 }
  0xab   :  { %1886 = vmatprep.subr.bf16.mxu0 %v2374_v38 }
  0xac   :  { %948 = vmatpush1.bf16.msra.mxu1 %v2119_v40  ;;  %v2082_v40 = vcombine.high %v98_v34, %v102_v35 }
  0xad   :  { %949 = vmatprep.subr.bf16.mxu1 %v2128_v41  ;;  %v106_v41 = vld [vmem:[#allocation5 + $0xd0] sm:$0xff] }
  0xae   :  { %v2090_v46 = vcombine.high %v106_v41, %v110_v42  ;;  %1887 = vmatpush1.bf16.msra.mxu0 %v2376_v43  ;;  %v83_v43 = vld [vmem:[#allocation5 + $0x18] sm:$0xff] }
  0xaf   :  { %1888 = vmatprep.subr.bf16.mxu0 %v2377_v44  ;;  %v87_v44 = vld [vmem:[#allocation5 + $0x38] sm:$0xff] }
  0xb0   :  { %950 = vmatpush1.bf16.msra.mxu1 %v2127_v45  ;;  %v2081_v45 = vcombine.low %v98_v34, %v102_v35  ;;  %v194_v35 = vld [vmem:[#allocation5 + $0x390] sm:$0xff] }
  0xb1   :  { %951 = vmatprep.subr.bf16.mxu1 %v2136_v47  ;;  %v114_v47 = vld [vmem:[#allocation5 + $0x110] sm:$0xff]  ;;  %v2178_v38 = vcombine.high %v194_v35, %v198_v36 }
  0xb2   :  { %v2098_v52 = vcombine.high %v114_v47, %v118_v48  ;;  %1889 = vmatpush1.bf16.msra.mxu0 %v2379_v49  ;;  %v2067_v49 = vcombine.low %v83_v43, %v87_v44 }
  0xb3   :  { %1890 = vmatprep.subr.bf16.mxu0 %v2380_v50 }
  0xb4   :  { %952 = vmatpush1.bf16.msra.mxu1 %v2135_v51  ;;  %v2089_v51 = vcombine.low %v106_v41, %v110_v42  ;;  %v2177_v41 = vcombine.low %v194_v35, %v198_v36  ;;  %v195_v36 = vld [vmem:[#allocation5 + $0x398] sm:$0xff] }
  0xb5   :  { %953 = vmatprep.subr.bf16.mxu1 %v2144_v53  ;;  %v122_v53 = vld [vmem:[#allocation5 + $0x150] sm:$0xff] }
  0xb6   :  { %v2106_v58 = vcombine.high %v122_v53, %v126_v54  ;;  %1891 = vmatpush1.bf16.msra.mxu0 %v2382_v55  ;;  %v2105_v61 = vcombine.low %v122_v53, %v126_v54  ;;  %v107_v55 = vld [vmem:[#allocation5 + $0xd8] sm:$0xff] }
  0xb7   :  { %1892 = vmatprep.subr.bf16.mxu0 %v2383_v56  ;;  %v111_v56 = vld [vmem:[#allocation5 + $0xf8] sm:$0xff] }
  0xb8   :  { %954 = vmatpush1.bf16.msra.mxu1 %v2143_v57  ;;  %v2097_v57 = vcombine.low %v114_v47, %v118_v48  ;;  %v91_v47 = vld [vmem:[#allocation5 + $0x58] sm:$0xff] }
  0xb9   :  { %955 = vmatprep.subr.bf16.mxu1 %v2152_v59  ;;  %v130_v59 = vld [vmem:[#allocation5 + $0x190] sm:$0xff]  ;;  %v95_v48 = vld [vmem:[#allocation5 + $0x78] sm:$0xff] }
  0xba   :  { %1893 = vmatpush1.bf16.msra.mxu0 %v2385_v62  ;;  %v2113_v3 = vcombine.low %v130_v59, %v134_v60  ;;  %v2076_v50 = vcombine.high %v91_v47, %v95_v48  ;;  %v2075_v53 = vcombine.low %v91_v47, %v95_v48  ;;  %v2768_v48 = vld [vmem:[#allocation7] sm:$0xff] }
  0xbb   :  { %1894 = vmatprep.subr.bf16.mxu0 %v2386_v2  ;;  %v131_v2 = vld [vmem:[#allocation5 + $0x198] sm:$0xff] }
  0xbc   :  { %956 = vmatpush1.bf16.msra.mxu1 %v2151_v63  ;;  %v2114_v63 = vcombine.high %v130_v59, %v134_v60  ;;  %v115_v59 = vld [vmem:[#allocation5 + $0x118] sm:$0xff] }
  0xbd   :  { %957 = vmatprep.subr.bf16.mxu1 %v2160_v1  ;;  %v142_v1 = vld [vmem:[#allocation5 + $0x1f0] sm:$0xff]  ;;  %v119_v60 = vld [vmem:[#allocation5 + $0x138] sm:$0xff] }
  0xbe   :  { %1895 = vmatpush1.bf16.msra.mxu0 %v2388_v4  ;;  %v2121_v9 = vcombine.low %v138_v0, %v142_v1  ;;  %v2100_v62 = vcombine.high %v115_v59, %v119_v60 }
  0xbf   :  { %1896 = vmatprep.subr.bf16.mxu0 %v2389_v8 }
  0xc0   :  { %958 = vmatpush1.bf16.msra.mxu1 %v2159_v5  ;;  %v2122_v5 = vcombine.high %v138_v0, %v142_v1  ;;  %v127_v0 = vld [vmem:[#allocation5 + $0x178] sm:$0xff]  ;;  %v2099_v1 = vcombine.low %v115_v59, %v119_v60 }
  0xc1   :  { %959 = vmatprep.subr.bf16.mxu1 %v2168_v7  ;;  %v150_v7 = vld [vmem:[#allocation5 + $0x230] sm:$0xff] }
  0xc2   :  { %1897 = vmatpush1.bf16.msra.mxu0 %v2391_v11  ;;  %v2129_v16 = vcombine.low %v146_v6, %v150_v7  ;;  %v147_v11 = vld [vmem:[#allocation5 + $0x218] sm:$0xff] }
  0xc3   :  { %1909 = vmatprep.subr.bf16.mxu0 %v2394_v15  ;;  %v155_v15 = vld [vmem:[#allocation5 + $0x258] sm:$0xff] }
  0xc4   :  { %960 = vmatpush1.bf16.msra.mxu1 %v2167_v12  ;;  %v2130_v12 = vcombine.high %v146_v6, %v150_v7  ;;  %v139_v6 = vld [vmem:[#allocation5 + $0x1d8] sm:$0xff] }
  0xc5   :  { %961 = vmatprep.subr.bf16.mxu1 %v2176_v14  ;;  %v158_v14 = vld [vmem:[#allocation5 + $0x270] sm:$0xff]  ;;  %v143_v7 = vld [vmem:[#allocation5 + $0x1f8] sm:$0xff] }
  0xc6   :  { %v2138_v17 = vcombine.high %v154_v13, %v158_v14 }
  0xc8   :  { %962 = vmatpush1.bf16.msra.mxu1 %v2175_v18  ;;  %v162_v18 = vld [vmem:[#allocation5 + $0x290] sm:$0xff] }
  0xc9   :  { %963 = vmatprep.subr.bf16.mxu1 %v2184_v21  ;;  %v2137_v21 = vcombine.low %v154_v13, %v158_v14  ;;  %v2146_v22 = vcombine.high %v162_v18, %v166_v19  ;;  %v2123_v13 = vcombine.low %v139_v6, %v143_v7 }
  0xcc   :  { %964 = vmatpush1.bf16.msra.mxu1 %v2183_v25  ;;  %v2145_v25 = vcombine.low %v162_v18, %v166_v19  ;;  %v163_v19 = vld [vmem:[#allocation5 + $0x298] sm:$0xff] }
  0xcd   :  { %976 = vmatprep.subr.bf16.mxu1 %v2066_v27  ;;  %v178_v27 = vld [vmem:[#allocation5 + $0x310] sm:$0xff] }
  0xce   :  { %v2162_v30 = vcombine.high %v178_v27, %v182_v28 }
  0xcf   :  { %966 = vmatmul.mubr.bf16.vlgmr.msra.gmra.mrb[4].mxu1 %v2756_v10 }
  0xd0   :  { %977 = vmatpush1.bf16.msra.mxu1 %v2065_v31  ;;  %1008 = vmatprep.mubr.bf16.mxu1 %v2753_v20  ;;  %v186_v31 = vld [vmem:[#allocation5 + $0x350] sm:$0xff] }
  0xd1   :  { %978 = vmatprep.subr.bf16.mxu1 %v2074_v33  ;;  %v2161_v33 = vcombine.low %v178_v27, %v182_v28  ;;  %v2170_v34 = vcombine.high %v186_v31, %v190_v32  ;;  %v2169_v37 = vcombine.low %v186_v31, %v190_v32  ;;  %v179_v28 = vld [vmem:[#allocation5 + $0x318] sm:$0xff] }
  0xd2   :  { %v187_v32 = vld [vmem:[#allocation5 + $0x358] sm:$0xff] }
  0xd4   :  { %979 = vmatpush1.bf16.msra.mxu1 %v2073_v39  ;;  %v202_v39 = vld [vmem:[#allocation5 + $0x3d0] sm:$0xff] }
  0xd5   :  { %980 = vmatprep.subr.bf16.mxu1 %v2082_v40  ;;  %v206_v40 = vld [vmem:[#allocation5 + $0x3f0] sm:$0xff] }
  0xd6   :  { %v2186_v42 = vcombine.high %v202_v39, %v206_v40 }
  0xd8   :  { %981 = vmatpush1.bf16.msra.mxu1 %v2081_v45  ;;  %v2185_v45 = vcombine.low %v202_v39, %v206_v40  ;;  %v203_v40 = vld [vmem:[#allocation5 + $0x3d8] sm:$0xff] }
  0xd9   :  { %982 = vmatprep.subr.bf16.mxu1 %v2090_v46  ;;  %v2068_v46 = vcombine.high %v83_v43, %v87_v44 }
  0xdc   :  { %983 = vmatpush1.bf16.msra.mxu1 %v2089_v51  ;;  %v99_v51 = vld [vmem:[#allocation5 + $0x98] sm:$0xff] }
  0xdd   :  { %984 = vmatprep.subr.bf16.mxu1 %v2098_v52  ;;  %v103_v52 = vld [vmem:[#allocation5 + $0xb8] sm:$0xff] }
  0xde   :  { %v2084_v54 = vcombine.high %v99_v51, %v103_v52 }
  0xe0   :  { %985 = vmatpush1.bf16.msra.mxu1 %v2097_v57  ;;  %v2083_v57 = vcombine.low %v99_v51, %v103_v52 }
  0xe1   :  { %986 = vmatprep.subr.bf16.mxu1 %v2106_v58  ;;  %v2092_v58 = vcombine.high %v107_v55, %v111_v56 }
  0xe4   :  { %987 = vmatpush1.bf16.msra.mxu1 %v2105_v61  ;;  %v2091_v61 = vcombine.low %v107_v55, %v111_v56 }
  0xe5   :  { %988 = vmatprep.subr.bf16.mxu1 %v2114_v63  ;;  %v123_v63 = vld [vmem:[#allocation5 + $0x158] sm:$0xff] }
  0xe6   :  { %v2107_v4 = vcombine.low %v123_v63, %v127_v0 }
  0xe8   :  { %989 = vmatpush1.bf16.msra.mxu1 %v2113_v3  ;;  %v135_v3 = vld [vmem:[#allocation5 + $0x1b8] sm:$0xff] }
  0xe9   :  { %990 = vmatprep.subr.bf16.mxu1 %v2122_v5  ;;  %v2116_v5 = vcombine.high %v131_v2, %v135_v3  ;;  %v2115_v8 = vcombine.low %v131_v2, %v135_v3  ;;  %v2395_v2 = vld [vmem:[#allocation8 + $0x110] ss:$8 sps:$4 sm:$0xff]   ;;  %v2400_v3 = vld [vmem:[#allocation8 + $0x124] ss:$8 sps:$4 sm:$0xff]  }
  0xec   :  { %991 = vmatpush1.bf16.msra.mxu1 %v2121_v9  ;;  %v2124_v9 = vcombine.high %v139_v6, %v143_v7  ;;  %v2401_v6 = vld [vmem:[#allocation8 + $0x130] ss:$8 sps:$4 sm:$0xff]   ;;  %v2406_v7 = vld [vmem:[#allocation8 + $0x144] ss:$8 sps:$4 sm:$0xff]  }
  0xed   :  { %992 = vmatprep.subr.bf16.mxu1 %v2130_v12  ;;  %v151_v12 = vld [vmem:[#allocation5 + $0x238] sm:$0xff] }
  0xee   :  { %v2132_v14 = vcombine.high %v147_v11, %v151_v12 }
  0xf0   :  { %993 = vmatpush1.bf16.msra.mxu1 %v2129_v16  ;;  %v159_v16 = vld [vmem:[#allocation5 + $0x278] sm:$0xff] }
  0xf1   :  { %994 = vmatprep.subr.bf16.mxu1 %v2138_v17  ;;  %v2131_v17 = vcombine.low %v147_v11, %v151_v12  ;;  %v2140_v18 = vcombine.high %v155_v15, %v159_v16  ;;  %v2407_v11 = vld [vmem:[#allocation8 + $0x150] ss:$8 sps:$4 sm:$0xff]   ;;  %v2412_v12 = vld [vmem:[#allocation8 + $0x164] ss:$8 sps:$4 sm:$0xff]  }
  0xf4   :  { %995 = vmatpush1.bf16.msra.mxu1 %v2137_v21  ;;  %v167_v21 = vld [vmem:[#allocation5 + $0x2b8] sm:$0xff] }
  0xf5   :  { %996 = vmatprep.subr.bf16.mxu1 %v2146_v22  ;;  %v2139_v22 = vcombine.low %v155_v15, %v159_v16  ;;  %v2148_v23 = vcombine.high %v163_v19, %v167_v21  ;;  %v2413_v15 = vld [vmem:[#allocation8 + $0x170] ss:$8 sps:$4 sm:$0xff]   ;;  %v2418_v16 = vld [vmem:[#allocation8 + $0x184] ss:$8 sps:$4 sm:$0xff]  }
  0xf8   :  { %997 = vmatpush1.bf16.msra.mxu1 %v2145_v25  ;;  %v175_v25 = vld [vmem:[#allocation5 + $0x2f8] sm:$0xff] }
  0xf9   :  { %998 = vmatprep.subr.bf16.mxu1 %v2154_v26  ;;  %v2147_v26 = vcombine.low %v163_v19, %v167_v21  ;;  %v2156_v27 = vcombine.high %v171_v24, %v175_v25  ;;  %v2419_v19 = vld [vmem:[#allocation8 + $0x190] ss:$8 sps:$4 sm:$0xff]   ;;  %v2424_v21 = vld [vmem:[#allocation8 + $0x1a4] ss:$8 sps:$4 sm:$0xff]  }
  0xfc   :  { %999 = vmatpush1.bf16.msra.mxu1 %v2153_v29  ;;  %v183_v29 = vld [vmem:[#allocation5 + $0x338] sm:$0xff] }
  0xfd   :  { %1000 = vmatprep.subr.bf16.mxu1 %v2162_v30  ;;  %v2155_v30 = vcombine.low %v171_v24, %v175_v25  ;;  %v2164_v31 = vcombine.high %v179_v28, %v183_v29  ;;  %v2425_v24 = vld [vmem:[#allocation8 + $0x1b0] ss:$8 sps:$4 sm:$0xff]   ;;  %v2430_v25 = vld [vmem:[#allocation8 + $0x1c4] ss:$8 sps:$4 sm:$0xff]  }
 0x100   :  { %1001 = vmatpush1.bf16.msra.mxu1 %v2161_v33  ;;  %v191_v33 = vld [vmem:[#allocation5 + $0x378] sm:$0xff] }
 0x101   :  { %1002 = vmatprep.subr.bf16.mxu1 %v2170_v34  ;;  %v2163_v34 = vcombine.low %v179_v28, %v183_v29  ;;  %v2172_v35 = vcombine.high %v187_v32, %v191_v33 }
 0x104   :  { %1003 = vmatpush1.bf16.msra.mxu1 %v2169_v37  ;;  %v199_v37 = vld [vmem:[#allocation5 + $0x3b8] sm:$0xff] }
 0x105   :  { %1004 = vmatprep.subr.bf16.mxu1 %v2178_v38  ;;  %v2171_v38 = vcombine.low %v187_v32, %v191_v33  ;;  %v2180_v39 = vcombine.high %v195_v36, %v199_v37  ;;  %v2436_v32 = vld [vmem:[#allocation8 + $0x1e4] ss:$8 sps:$4 sm:$0xff]  }
 0x108   :  { %1005 = vmatpush1.bf16.msra.mxu1 %v2177_v41  ;;  %v207_v41 = vld [vmem:[#allocation5 + $0x3f8] sm:$0xff] }
 0x109   :  { %1006 = vmatprep.subr.bf16.mxu1 %v2186_v42  ;;  %v2179_v42 = vcombine.low %v195_v36, %v199_v37  ;;  %v2188_v43 = vcombine.high %v203_v40, %v207_v41  ;;  %v2187_v44 = vcombine.low %v203_v40, %v207_v41 }
 0x10c   :  { %1007 = vmatpush1.bf16.msra.mxu1 %v2185_v45  ;;  %v210_v45 = vlaneseq }
 0x10d   :  { %1019 = vmatprep.subr.bf16.mxu1 %v2068_v46 }
 0x10e   :  { %v2765_v46 = vshrl.u32 %v210_v45, 7  ;;  %v2437_v45 = vld [vmem:[#allocation8 + $0x1f0] ss:$8 sps:$4 sm:$0xff]  }
 0x10f   :  { %1009 = vmatmul.mubr.bf16.vlgmr.msra.gmra.mrb[8].mxu1 %v2756_v10 }
 0x110   :  { %1020 = vmatpush1.bf16.msra.mxu1 %v2067_v49  ;;  %1051 = vmatprep.mubr.bf16.mxu1 %v2753_v20  ;;  %v2108_v20 = vcombine.high %v123_v63, %v127_v0  ;;  %v212_v47 = vsub.s32 0, %v2765_v46  ;;  %v216_v49 = vsub.s32 1, %v2765_v46  ;;  %v220_v28 = vsub.s32 2, %v2765_v46 }
 0x111   :  { %1021 = vmatprep.subr.bf16.mxu1 %v2076_v50  ;;  %v224_v29 = vsub.s32 3, %v2765_v46 }
 0x112   :  { %v213_v50 = vrot.slane %v2768_v48, %v212_v47  ;;  %v217_v51 = vrot.slane %v2768_v48, %v216_v49 }
 0x113   :  { %v225_v33 = vrot.slane %v2768_v48, %v224_v29 }
 0x114   :  { %1022 = vmatpush1.bf16.msra.mxu1 %v2075_v53 }
 0x115   :  { %1023 = vmatprep.subr.bf16.mxu1 %v2084_v54 }
 0x118   :  { %1024 = vmatpush1.bf16.msra.mxu1 %v2083_v57 }
 0x119   :  { %1025 = vmatprep.subr.bf16.mxu1 %v2092_v58 }
 0x11c   :  { %1026 = vmatpush1.bf16.msra.mxu1 %v2091_v61 }
 0x11d   :  { %1027 = vmatprep.subr.bf16.mxu1 %v2100_v62 }
 0x120   :  { %1028 = vmatpush1.bf16.msra.mxu1 %v2099_v1  ;;  %v2392_v1 = vld [vmem:[#allocation8 + $0x100] ss:$8 sps:$4 sm:$0xff]  }
 0x121   :  { %1029 = vmatprep.subr.bf16.mxu1 %v2108_v20  ;;  %v2397_v20 = vld [vmem:[#allocation8 + $0x114] ss:$8 sps:$4 sm:$0xff]  }
 0x124   :  { %1030 = vmatpush1.bf16.msra.mxu1 %v2107_v4  ;;  %v2398_v4 = vld [vmem:[#allocation8 + $0x120] ss:$8 sps:$4 sm:$0xff]  }
 0x125   :  { %1031 = vmatprep.subr.bf16.mxu1 %v2116_v5  ;;  %v2403_v5 = vld [vmem:[#allocation8 + $0x134] ss:$8 sps:$4 sm:$0xff]  }
 0x128   :  { %1032 = vmatpush1.bf16.msra.mxu1 %v2115_v8  ;;  %v2404_v8 = vld [vmem:[#allocation8 + $0x140] ss:$8 sps:$4 sm:$0xff]  }
 0x129   :  { %1033 = vmatprep.subr.bf16.mxu1 %v2124_v9  ;;  %v2409_v9 = vld [vmem:[#allocation8 + $0x154] ss:$8 sps:$4 sm:$0xff]  }
 0x12c   :  { %1034 = vmatpush1.bf16.msra.mxu1 %v2123_v13  ;;  %v2410_v13 = vld [vmem:[#allocation8 + $0x160] ss:$8 sps:$4 sm:$0xff]  }
 0x12d   :  { %1035 = vmatprep.subr.bf16.mxu1 %v2132_v14  ;;  %v2415_v14 = vld [vmem:[#allocation8 + $0x174] ss:$8 sps:$4 sm:$0xff]  }
 0x130   :  { %1036 = vmatpush1.bf16.msra.mxu1 %v2131_v17  ;;  %v2416_v17 = vld [vmem:[#allocation8 + $0x180] ss:$8 sps:$4 sm:$0xff]  }
 0x131   :  { %1037 = vmatprep.subr.bf16.mxu1 %v2140_v18  ;;  %v2421_v18 = vld [vmem:[#allocation8 + $0x194] ss:$8 sps:$4 sm:$0xff]  }
 0x134   :  { %1038 = vmatpush1.bf16.msra.mxu1 %v2139_v22  ;;  %v2422_v22 = vld [vmem:[#allocation8 + $0x1a0] ss:$8 sps:$4 sm:$0xff]  }
 0x135   :  { %1039 = vmatprep.subr.bf16.mxu1 %v2148_v23  ;;  %v2427_v23 = vld [vmem:[#allocation8 + $0x1b4] ss:$8 sps:$4 sm:$0xff]  }
 0x138   :  { %1040 = vmatpush1.bf16.msra.mxu1 %v2147_v26  ;;  %v2428_v26 = vld [vmem:[#allocation8 + $0x1c0] ss:$8 sps:$4 sm:$0xff]  }
 0x139   :  { %1041 = vmatprep.subr.bf16.mxu1 %v2156_v27  ;;  %v2433_v27 = vld [vmem:[#allocation8 + $0x1d4] ss:$8 sps:$4 sm:$0xff]  }
 0x13c   :  { %1042 = vmatpush1.bf16.msra.mxu1 %v2155_v30  ;;  %v2431_v30 = vld [vmem:[#allocation8 + $0x1d0] ss:$8 sps:$4 sm:$0xff]  }
 0x13d   :  { %1043 = vmatprep.subr.bf16.mxu1 %v2164_v31  ;;  %v221_v31 = vrot.slane %v2768_v48, %v220_v28  ;;  %v2487_v28 = vld [vmem:[#allocation8 + $0x2f4] ss:$8 sps:$4 sm:$0xff]  }
 0x140   :  { %1044 = vmatpush1.bf16.msra.mxu1 %v2163_v34 }
 0x141   :  { %1045 = vmatprep.subr.bf16.mxu1 %v2172_v35  ;;  %v2434_v35 = vld [vmem:[#allocation8 + $0x1e0] ss:$8 sps:$4 sm:$0xff]  }
 0x144   :  { %1046 = vmatpush1.bf16.msra.mxu1 %v2171_v38  ;;  %v2439_v38 = vld [vmem:[#allocation8 + $0x1f4] ss:$8 sps:$4 sm:$0xff]  }
 0x145   :  { %1047 = vmatprep.subr.bf16.mxu1 %v2180_v39 }
 0x148   :  { %1048 = vmatpush1.bf16.msra.mxu1 %v2179_v42 }
 0x149   :  { %1049 = vmatprep.subr.bf16.mxu1 %v2188_v43 }
 0x14c   :  { %1050 = vmatpush1.bf16.msra.mxu1 %v2187_v44 }
 0x14f   :  { %1052 = vmatmul.mubr.bf16.vlgmr.msra.gmra.mrb[12].mxu1 %v2756_v10 }
 0x162   :  { %v924_v52 = vpop.f32.mrb[0].mxu1 }
 0x163   :  { %v925_v53 = vadd.f32 %v924_v52, %v213_v50  ;;  %v926_v10 = vpop.f32.mrb[1].mxu1 }
 0x164   :  { %v927_v54 = vadd.f32 %v926_v10, %v217_v51  ;;  %v928_v55 = vpop.f32.mrb[2].mxu1 }
 0x165   :  { %v1062_v56 = vmax.f32 %v925_v53, 0.0  ;;  %v929_v57 = vadd.f32 %v928_v55, %v213_v50  ;;  %v930_v58 = vpop.f32.mrb[3].mxu1  ;;  %v2440_v55 = vld [vmem:[#allocation8 + $0x200] ss:$8 sps:$4 sm:$0xff]  }
 0x166   :  { %v931_v59 = vadd.f32 %v930_v58, %v217_v51  ;;  %v1063_v61 = vmax.f32 %v927_v54, 0.0  ;;  %v2442_v51 = vld [vmem:[#allocation8 + $0x204] ss:$8 sps:$4 sm:$0xff]  }
 0x167   :  { %v1070_v60 = vmax.f32 %v929_v57, 0.0  ;;  %v2443_v57 = vld [vmem:[#allocation8 + $0x210] ss:$8 sps:$4 sm:$0xff]   ;;  %v2448_v58 = vld [vmem:[#allocation8 + $0x224] ss:$8 sps:$4 sm:$0xff]  }
 0x168   :  { %v1071_v62 = vmax.f32 %v931_v59, 0.0  ;;  %v2446_v59 = vld [vmem:[#allocation8 + $0x220] ss:$8 sps:$4 sm:$0xff]  }
 0x169   :  { %v1078_v63 = vpack.c.bf16 %v1070_v60, %v1062_v56  ;;  %v2445_v56 = vld [vmem:[#allocation8 + $0x214] ss:$8 sps:$4 sm:$0xff]  }
 0x16a   :  { %v1079_v0 = vpack.c.bf16 %v1071_v62, %v1063_v61  ;;  %v2451_v60 = vld [vmem:[#allocation8 + $0x234] ss:$8 sps:$4 sm:$0xff]   ;;  %v2449_v61 = vld [vmem:[#allocation8 + $0x230] ss:$8 sps:$4 sm:$0xff]   ;;  %v2454_v62 = vld [vmem:[#allocation8 + $0x244] ss:$8 sps:$4 sm:$0xff]  }
 0x16c   :  { %1898 = vmatprep.mubr.bf16.mxu0 %v1079_v0  ;;  %v2457_v0 = vld [vmem:[#allocation8 + $0x254] ss:$8 sps:$4 sm:$0xff]  }
 0x16d   :  { %1899 = vmatmul.mubr.bf16.vlgmr.msra.gmra.mrb[0].mxu0 %v1078_v63  ;;  %v2452_v63 = vld [vmem:[#allocation8 + $0x240] ss:$8 sps:$4 sm:$0xff]  }
 0x16e   :  { %1910 = vmatpush1.bf16.msra.mxu0 %v2392_v1  ;;  %v2455_v1 = vld [vmem:[#allocation8 + $0x250] ss:$8 sps:$4 sm:$0xff]  }
 0x16f   :  { %1911 = vmatprep.subr.bf16.mxu0 %v2397_v20  ;;  %v2460_v20 = vld [vmem:[#allocation8 + $0x264] ss:$8 sps:$4 sm:$0xff]  }
 0x172   :  { %1912 = vmatpush1.bf16.msra.mxu0 %v2395_v2  ;;  %v2458_v2 = vld [vmem:[#allocation8 + $0x260] ss:$8 sps:$4 sm:$0xff]  }
 0x173   :  { %1913 = vmatprep.subr.bf16.mxu0 %v2400_v3  ;;  %v2463_v3 = vld [vmem:[#allocation8 + $0x274] ss:$8 sps:$4 sm:$0xff]  }
 0x176   :  { %1914 = vmatpush1.bf16.msra.mxu0 %v2398_v4  ;;  %v2461_v4 = vld [vmem:[#allocation8 + $0x270] ss:$8 sps:$4 sm:$0xff]  }
 0x177   :  { %1915 = vmatprep.subr.bf16.mxu0 %v2403_v5  ;;  %v2466_v5 = vld [vmem:[#allocation8 + $0x284] ss:$8 sps:$4 sm:$0xff]  }
 0x17a   :  { %1916 = vmatpush1.bf16.msra.mxu0 %v2401_v6  ;;  %v2464_v6 = vld [vmem:[#allocation8 + $0x280] ss:$8 sps:$4 sm:$0xff]  }
 0x17b   :  { %1917 = vmatprep.subr.bf16.mxu0 %v2406_v7  ;;  %v2469_v7 = vld [vmem:[#allocation8 + $0x294] ss:$8 sps:$4 sm:$0xff]  }
 0x17e   :  { %1918 = vmatpush1.bf16.msra.mxu0 %v2404_v8  ;;  %v2467_v8 = vld [vmem:[#allocation8 + $0x290] ss:$8 sps:$4 sm:$0xff]  }
 0x17f   :  { %1919 = vmatprep.subr.bf16.mxu0 %v2409_v9  ;;  %v2472_v9 = vld [vmem:[#allocation8 + $0x2a4] ss:$8 sps:$4 sm:$0xff]  }
 0x182   :  { %1920 = vmatpush1.bf16.msra.mxu0 %v2407_v11  ;;  %v2470_v11 = vld [vmem:[#allocation8 + $0x2a0] ss:$8 sps:$4 sm:$0xff]  }
 0x183   :  { %1921 = vmatprep.subr.bf16.mxu0 %v2412_v12  ;;  %v2475_v12 = vld [vmem:[#allocation8 + $0x2b4] ss:$8 sps:$4 sm:$0xff]  }
 0x186   :  { %1922 = vmatpush1.bf16.msra.mxu0 %v2410_v13  ;;  %v2473_v13 = vld [vmem:[#allocation8 + $0x2b0] ss:$8 sps:$4 sm:$0xff]  }
 0x187   :  { %1923 = vmatprep.subr.bf16.mxu0 %v2415_v14  ;;  %v2478_v14 = vld [vmem:[#allocation8 + $0x2c4] ss:$8 sps:$4 sm:$0xff]  }
 0x18a   :  { %1924 = vmatpush1.bf16.msra.mxu0 %v2413_v15  ;;  %v2476_v15 = vld [vmem:[#allocation8 + $0x2c0] ss:$8 sps:$4 sm:$0xff]  }
 0x18b   :  { %1925 = vmatprep.subr.bf16.mxu0 %v2418_v16  ;;  %v2481_v16 = vld [vmem:[#allocation8 + $0x2d4] ss:$8 sps:$4 sm:$0xff]  }
 0x18e   :  { %1926 = vmatpush1.bf16.msra.mxu0 %v2416_v17  ;;  %v228_v17 = vsub.s32 4, %v2765_v46 }
 0x18f   :  { %1927 = vmatprep.subr.bf16.mxu0 %v2421_v18  ;;  %v232_v18 = vsub.s32 5, %v2765_v46 }
 0x192   :  { %1928 = vmatpush1.bf16.msra.mxu0 %v2419_v19  ;;  %v2479_v19 = vld [vmem:[#allocation8 + $0x2d0] ss:$8 sps:$4 sm:$0xff]  }
 0x193   :  { %1929 = vmatprep.subr.bf16.mxu0 %v2424_v21  ;;  %v229_v21 = vrot.slane %v2768_v48, %v228_v17  ;;  %v2535_v17 = vld [vmem:[#allocation8 + $0x3f4] ss:$8 sps:$4 sm:$0xff]  }
 0x196   :  { %1930 = vmatpush1.bf16.msra.mxu0 %v2422_v22  ;;  %v2484_v22 = vld [vmem:[#allocation8 + $0x2e4] ss:$8 sps:$4 sm:$0xff]  }
 0x197   :  { %1931 = vmatprep.subr.bf16.mxu0 %v2427_v23  ;;  %v233_v23 = vrot.slane %v2768_v48, %v232_v18 }
 0x19a   :  { %1932 = vmatpush1.bf16.msra.mxu0 %v2425_v24 }
 0x19b   :  { %1933 = vmatprep.subr.bf16.mxu0 %v2430_v25  ;;  %v2482_v25 = vld [vmem:[#allocation8 + $0x2e0] ss:$8 sps:$4 sm:$0xff]  }
 0x19e   :  { %1934 = vmatpush1.bf16.msra.mxu0 %v2428_v26 }
 0x19f   :  { %1935 = vmatprep.subr.bf16.mxu0 %v2433_v27 }
 0x1a2   :  { %v967_v34 = vpop.f32.mrb[4].mxu1  ;;  %1936 = vmatpush1.bf16.msra.mxu0 %v2431_v30 }
 0x1a3   :  { %v968_v36 = vadd.f32 %v967_v34, %v221_v31  ;;  %v969_v37 = vpop.f32.mrb[5].mxu1  ;;  %1937 = vmatprep.subr.bf16.mxu0 %v2436_v32 }
 0x1a4   :  { %v970_v39 = vadd.f32 %v969_v37, %v225_v33  ;;  %v971_v40 = vpop.f32.mrb[6].mxu1  ;;  %v2490_v37 = vld [vmem:[#allocation8 + $0x304] ss:$8 sps:$4 sm:$0xff]  }
 0x1a5   :  { %v1064_v41 = vmax.f32 %v968_v36, 0.0  ;;  %v972_v42 = vadd.f32 %v971_v40, %v221_v31  ;;  %v973_v43 = vpop.f32.mrb[7].mxu1 }
 0x1a6   :  { %v974_v44 = vadd.f32 %v973_v43, %v225_v33  ;;  %1938 = vmatpush1.bf16.msra.mxu0 %v2434_v35  ;;  %v1065_v52 = vmax.f32 %v970_v39, 0.0  ;;  %v2485_v35 = vld [vmem:[#allocation8 + $0x2f0] ss:$8 sps:$4 sm:$0xff]   ;;  %v2493_v43 = vld [vmem:[#allocation8 + $0x314] ss:$8 sps:$4 sm:$0xff]  }
 0x1a7   :  { %v1072_v50 = vmax.f32 %v972_v42, 0.0  ;;  %1939 = vmatprep.subr.bf16.mxu0 %v2439_v38  ;;  %v2488_v42 = vld [vmem:[#allocation8 + $0x300] ss:$8 sps:$4 sm:$0xff]  }
 0x1a8   :  { %v1073_v53 = vmax.f32 %v974_v44, 0.0  ;;  %v2491_v44 = vld [vmem:[#allocation8 + $0x310] ss:$8 sps:$4 sm:$0xff]  }
 0x1a9   :  { %v1080_v10 = vpack.c.bf16 %v1072_v50, %v1064_v41  ;;  %v2494_v50 = vld [vmem:[#allocation8 + $0x320] ss:$8 sps:$4 sm:$0xff]  }
 0x1aa   :  { %v1081_v54 = vpack.c.bf16 %v1073_v53, %v1065_v52  ;;  %1940 = vmatpush1.bf16.msra.mxu0 %v2437_v45  ;;  %v2496_v45 = vld [vmem:[#allocation8 + $0x324] ss:$8 sps:$4 sm:$0xff]   ;;  %v2497_v52 = vld [vmem:[#allocation8 + $0x330] ss:$8 sps:$4 sm:$0xff]  }
 0x1ab   :  { %1952 = vmatprep.subr.bf16.mxu0 %v2442_v51  ;;  %v2499_v51 = vld [vmem:[#allocation8 + $0x334] ss:$8 sps:$4 sm:$0xff]   ;;  %v2502_v53 = vld [vmem:[#allocation8 + $0x344] ss:$8 sps:$4 sm:$0xff]  }
 0x1ac   :  { %1941 = vmatprep.mubr.bf16.mxu0 %v1081_v54  ;;  %v2505_v54 = vld [vmem:[#allocation8 + $0x354] ss:$8 sps:$4 sm:$0xff]  }
 0x1ad   :  { %1942 = vmatmul.mubr.bf16.vlgmr.msra.gmra.mrb[0].mxu0 %v1080_v10  ;;  %v2500_v10 = vld [vmem:[#allocation8 + $0x340] ss:$8 sps:$4 sm:$0xff]  }
 0x1ae   :  { %1953 = vmatpush1.bf16.msra.mxu0 %v2440_v55  ;;  %v2503_v55 = vld [vmem:[#allocation8 + $0x350] ss:$8 sps:$4 sm:$0xff]  }
 0x1af   :  { %1954 = vmatprep.subr.bf16.mxu0 %v2445_v56  ;;  %v2508_v56 = vld [vmem:[#allocation8 + $0x364] ss:$8 sps:$4 sm:$0xff]  }
 0x1b2   :  { %1955 = vmatpush1.bf16.msra.mxu0 %v2443_v57  ;;  %v2506_v57 = vld [vmem:[#allocation8 + $0x360] ss:$8 sps:$4 sm:$0xff]  }
 0x1b3   :  { %1956 = vmatprep.subr.bf16.mxu0 %v2448_v58  ;;  %v2511_v58 = vld [vmem:[#allocation8 + $0x374] ss:$8 sps:$4 sm:$0xff]  }
 0x1b6   :  { %1957 = vmatpush1.bf16.msra.mxu0 %v2446_v59  ;;  %v2509_v59 = vld [vmem:[#allocation8 + $0x370] ss:$8 sps:$4 sm:$0xff]  }
 0x1b7   :  { %1958 = vmatprep.subr.bf16.mxu0 %v2451_v60  ;;  %v2514_v60 = vld [vmem:[#allocation8 + $0x384] ss:$8 sps:$4 sm:$0xff]  }
 0x1ba   :  { %1959 = vmatpush1.bf16.msra.mxu0 %v2449_v61  ;;  %v2512_v61 = vld [vmem:[#allocation8 + $0x380] ss:$8 sps:$4 sm:$0xff]  }
 0x1bb   :  { %1960 = vmatprep.subr.bf16.mxu0 %v2454_v62  ;;  %v2517_v62 = vld [vmem:[#allocation8 + $0x394] ss:$8 sps:$4 sm:$0xff]  }
 0x1be   :  { %1961 = vmatpush1.bf16.msra.mxu0 %v2452_v63  ;;  %v2515_v63 = vld [vmem:[#allocation8 + $0x390] ss:$8 sps:$4 sm:$0xff]  }
 0x1bf   :  { %1962 = vmatprep.subr.bf16.mxu0 %v2457_v0  ;;  %v2520_v0 = vld [vmem:[#allocation8 + $0x3a4] ss:$8 sps:$4 sm:$0xff]  }
 0x1c2   :  { %1963 = vmatpush1.bf16.msra.mxu0 %v2455_v1  ;;  %v2518_v1 = vld [vmem:[#allocation8 + $0x3a0] ss:$8 sps:$4 sm:$0xff]  }
 0x1c3   :  { %1964 = vmatprep.subr.bf16.mxu0 %v2460_v20  ;;  %v2523_v20 = vld [vmem:[#allocation8 + $0x3b4] ss:$8 sps:$4 sm:$0xff]  }
 0x1c6   :  { %1965 = vmatpush1.bf16.msra.mxu0 %v2458_v2  ;;  %v2521_v2 = vld [vmem:[#allocation8 + $0x3b0] ss:$8 sps:$4 sm:$0xff]  }
 0x1c7   :  { %1966 = vmatprep.subr.bf16.mxu0 %v2463_v3  ;;  %v2526_v3 = vld [vmem:[#allocation8 + $0x3c4] ss:$8 sps:$4 sm:$0xff]  }
 0x1ca   :  { %1967 = vmatpush1.bf16.msra.mxu0 %v2461_v4  ;;  %v2524_v4 = vld [vmem:[#allocation8 + $0x3c0] ss:$8 sps:$4 sm:$0xff]  }
 0x1cb   :  { %1968 = vmatprep.subr.bf16.mxu0 %v2466_v5  ;;  %v2529_v5 = vld [vmem:[#allocation8 + $0x3d4] ss:$8 sps:$4 sm:$0xff]  }
 0x1ce   :  { %1969 = vmatpush1.bf16.msra.mxu0 %v2464_v6  ;;  %v236_v6 = vsub.s32 6, %v2765_v46 }
 0x1cf   :  { %1970 = vmatprep.subr.bf16.mxu0 %v2469_v7  ;;  %v240_v7 = vsub.s32 7, %v2765_v46 }
 0x1d2   :  { %1971 = vmatpush1.bf16.msra.mxu0 %v2467_v8  ;;  %v2527_v8 = vld [vmem:[#allocation8 + $0x3d0] ss:$8 sps:$4 sm:$0xff]  }
 0x1d3   :  { %1972 = vmatprep.subr.bf16.mxu0 %v2472_v9  ;;  %v237_v9 = vrot.slane %v2768_v48, %v236_v6 }
 0x1d6   :  { %1973 = vmatpush1.bf16.msra.mxu0 %v2470_v11  ;;  %v2532_v11 = vld [vmem:[#allocation8 + $0x3e4] ss:$8 sps:$4 sm:$0xff]  }
 0x1d7   :  { %1974 = vmatprep.subr.bf16.mxu0 %v2475_v12  ;;  %v241_v12 = vrot.slane %v2768_v48, %v240_v7 }
 0x1da   :  { %1975 = vmatpush1.bf16.msra.mxu0 %v2473_v13 }
 0x1db   :  { %1976 = vmatprep.subr.bf16.mxu0 %v2478_v14  ;;  %v2530_v14 = vld [vmem:[#allocation8 + $0x3e0] ss:$8 sps:$4 sm:$0xff]  }
 0x1de   :  { %1977 = vmatpush1.bf16.msra.mxu0 %v2476_v15 }
 0x1df   :  { %1978 = vmatprep.subr.bf16.mxu0 %v2481_v16 }
 0x1e2   :  { %v1010_v24 = vpop.f32.mrb[8].mxu1  ;;  %1979 = vmatpush1.bf16.msra.mxu0 %v2479_v19 }
 0x1e3   :  { %v1011_v26 = vadd.f32 %v1010_v24, %v229_v21  ;;  %v1012_v27 = vpop.f32.mrb[9].mxu1  ;;  %1980 = vmatprep.subr.bf16.mxu0 %v2484_v22  ;;  %v2533_v24 = vld [vmem:[#allocation8 + $0x3f0] ss:$8 sps:$4 sm:$0xff]  }
 0x1e4   :  { %v1013_v29 = vadd.f32 %v1012_v27, %v233_v23  ;;  %v1014_v30 = vpop.f32.mrb[10].mxu1 }
 0x1e5   :  { %v1066_v31 = vmax.f32 %v1011_v26, 0.0  ;;  %v1015_v32 = vadd.f32 %v1014_v30, %v229_v21  ;;  %v1016_v33 = vpop.f32.mrb[11].mxu1  ;;  %v1214_v30 = vld [vmem:[%s2815_s4] sm:$0x3]  ;;  %s2624_s4 = scalar_lea.vmem %s2048_s22, 512 }
 0x1e6   :  { %v1017_v34 = vadd.f32 %v1016_v33, %v233_v23  ;;  %1981 = vmatpush1.bf16.msra.mxu0 %v2482_v25  ;;  %v1067_v38 = vmax.f32 %v1013_v29, 0.0  ;;  %p2625_p4 = scmp.ne.s32.totalorder %s2048_s22, %s2624_s4  ;;  %p2630_p6 = scmp.lt.s32.totalorder %s2624_s4, %s2624_s4 }
 0x1e7   :  { %v1074_v36 = vmax.f32 %v1015_v32, 0.0  ;;  %1982 = vmatprep.subr.bf16.mxu0 %v2487_v28  ;;  %v1223_v32 = vrot.slane %v1214_v30, %v216_v49 }
 0x1e8   :  { %v1075_v39 = vmax.f32 %v1017_v34, 0.0  ;;  %p2631_p7 = por %p2630_p6, %p2629_p5 }
 0x1e9   :  { %v1082_v40 = vpack.c.bf16 %v1074_v36, %v1066_v31  ;;  %v1219_v31 = vrot.slane %v1214_v30, %v212_v47 }
 0x1ea   :  { %v1083_v41 = vpack.c.bf16 %v1075_v39, %v1067_v38  ;;  %1983 = vmatpush1.bf16.msra.mxu0 %v2485_v35  ;;  %p2632_p8 = pnand %p2631_p7, %p2625_p4 }
 0x1eb   :  { %1995 = vmatprep.subr.bf16.mxu0 %v2490_v37 }
 0x1ec   :  { %1984 = vmatprep.mubr.bf16.mxu0 %v1083_v41 }
 0x1ed   :  { %1985 = vmatmul.mubr.bf16.vlgmr.msra.gmra.mrb[0].mxu0 %v1082_v40 }
 0x1ee   :  { %1996 = vmatpush1.bf16.msra.mxu0 %v2488_v42 }
 0x1ef   :  { %1997 = vmatprep.subr.bf16.mxu0 %v2493_v43 }
 0x1f2   :  { %1998 = vmatpush1.bf16.msra.mxu0 %v2491_v44 }
 0x1f3   :  { %1999 = vmatprep.subr.bf16.mxu0 %v2496_v45 }
 0x1f6   :  { %2000 = vmatpush1.bf16.msra.mxu0 %v2494_v50 }
 0x1f7   :  { %2001 = vmatprep.subr.bf16.mxu0 %v2499_v51 }
 0x1fa   :  { %2002 = vmatpush1.bf16.msra.mxu0 %v2497_v52 }
 0x1fb   :  { %2003 = vmatprep.subr.bf16.mxu0 %v2502_v53 }
 0x1fe   :  { %2004 = vmatpush1.bf16.msra.mxu0 %v2500_v10 }
 0x1ff   :  { %2005 = vmatprep.subr.bf16.mxu0 %v2505_v54 }
 0x202   :  { %2006 = vmatpush1.bf16.msra.mxu0 %v2503_v55 }
 0x203   :  { %2007 = vmatprep.subr.bf16.mxu0 %v2508_v56 }
 0x206   :  { %2008 = vmatpush1.bf16.msra.mxu0 %v2506_v57 }
 0x207   :  { %2009 = vmatprep.subr.bf16.mxu0 %v2511_v58 }
 0x20a   :  { %2010 = vmatpush1.bf16.msra.mxu0 %v2509_v59 }
 0x20b   :  { %2011 = vmatprep.subr.bf16.mxu0 %v2514_v60 }
 0x20e   :  { %2012 = vmatpush1.bf16.msra.mxu0 %v2512_v61 }
 0x20f   :  { %2013 = vmatprep.subr.bf16.mxu0 %v2517_v62 }
 0x212   :  { %2014 = vmatpush1.bf16.msra.mxu0 %v2515_v63 }
 0x213   :  { %2015 = vmatprep.subr.bf16.mxu0 %v2520_v0 }
 0x216   :  { %2016 = vmatpush1.bf16.msra.mxu0 %v2518_v1 }
 0x217   :  { %2017 = vmatprep.subr.bf16.mxu0 %v2523_v20 }
 0x21a   :  { %2018 = vmatpush1.bf16.msra.mxu0 %v2521_v2 }
 0x21b   :  { %2019 = vmatprep.subr.bf16.mxu0 %v2526_v3 }
 0x21e   :  { %2020 = vmatpush1.bf16.msra.mxu0 %v2524_v4 }
 0x21f   :  { %2021 = vmatprep.subr.bf16.mxu0 %v2529_v5 }
 0x222   :  { %v1053_v13 = vpop.f32.mrb[12].mxu1  ;;  %2022 = vmatpush1.bf16.msra.mxu0 %v2527_v8 }
 0x223   :  { %v1054_v15 = vadd.f32 %v1053_v13, %v237_v9  ;;  %v1055_v16 = vpop.f32.mrb[13].mxu1  ;;  %2023 = vmatprep.subr.bf16.mxu0 %v2532_v11 }
 0x224   :  { %v1056_v18 = vadd.f32 %v1055_v16, %v241_v12  ;;  %v1057_v19 = vpop.f32.mrb[14].mxu1 }
 0x225   :  { %v1058_v21 = vadd.f32 %v1057_v19, %v237_v9  ;;  %v1059_v22 = vpop.f32.mrb[15].mxu1  ;;  %v1068_v25 = vmax.f32 %v1054_v15, 0.0 }
 0x226   :  { %v1060_v23 = vadd.f32 %v1059_v22, %v241_v12  ;;  %2024 = vmatpush1.bf16.msra.mxu0 %v2530_v14  ;;  %v1069_v27 = vmax.f32 %v1056_v18, 0.0 }
 0x227   :  { %v1076_v26 = vmax.f32 %v1058_v21, 0.0  ;;  %2025 = vmatprep.subr.bf16.mxu0 %v2535_v17 }
 0x228   :  { %v1077_v28 = vmax.f32 %v1060_v23, 0.0 }
 0x229   :  { %v1084_v48 = vpack.c.bf16 %v1076_v26, %v1068_v25 }
 0x22a   :  { %v1085_v29 = vpack.c.bf16 %v1077_v28, %v1069_v27  ;;  %2026 = vmatpush1.bf16.msra.mxu0 %v2533_v24 }
 0x22c   :  { %2027 = vmatprep.mubr.bf16.mxu0 %v1085_v29 }
 0x22d   :  { %2028 = vmatmul.mubr.bf16.vlgmr.msra.gmra.mrb[0].mxu0 %v1084_v48 }
 0x300   :  { %v2029_v33 = vpop.f32.mrb[0].mxu0 }
 0x301   :  { %v2317_v34 = vadd.f32 %v2029_v33, %v1219_v31  ;;  %v2031_v35 = vpop.f32.mrb[1].mxu0 }
 0x302   :  { %v2318_v36 = vadd.f32 %v2031_v35, %v1223_v32  ;;  %v2033_v37 = vpop.f32.mrb[2].mxu0 }
 0x303   :  { %2038 = vst [vmem:[#allocation10] sm:$0xff] %v2317_v34  ;;  %v2319_v38 = vadd.f32 %v2033_v37, %v1219_v31  ;;  %v2035_v39 = vpop.f32.mrb[3].mxu0 }
 0x304   :  { %2039 = vst [vmem:[#allocation10 + $0x8] sm:$0xff] %v2318_v36  ;;  %v2320_v40 = vadd.f32 %v2035_v39, %v1223_v32 }
 0x305   :  { %2040 = vst [vmem:[#allocation10 + $0x10] sm:$0xff] %v2319_v38 }
 0x306   :  { %2041 = vst [vmem:[#allocation10 + $0x18] sm:$0xff] %v2320_v40 }
 0x307   :  { %2635 = shalt.err (!%p2632_p8)
}
 0x308   :  { %s2636_s25 = scalar_lea.hbm %s2816_s5, 512 }
 0x309   :  { %p2637_p9 = scmp.ne.s32.totalorder %s2816_s5, %s2636_s25  ;;  %p2640_p10 = scmp.lt.u32.totalorder %s2636_s25, %s2816_s5 }
 0x30b   :  { %p2642_p11 = pnand %p2640_p10, %p2637_p9 }
 0x30d   :  { %2645 = shalt.err (!%p2642_p11)
}
 0x30e   :  { %2053 = dma.vmem_to_hbm [thread:$0]  %s2048_s22, 512, %s2816_s5, [#allocation4], %s2658_s1, %s2658_s1, %s2659_s17  }
 0x30f   :  { %2652 = dma.done.wait [#allocation4], 512  }
 0x310   :  { %2653 = vsyncadd [#allocation4], 4294966784 }
 0x311   :  { %2057 = vsyncpa [#allocation3], 1 }
 0x312   :  { %2058 = vsyncpa [#allocation6], 1 }
 0x313   :  { %2059 = vsyncpa [#allocation9], 1 }
 0x314   :  { %2060 = vsyncpa [#allocation4], 1 }

</bundles_post_ra>
